<compile_context>
chip_gen: v7x
topology: tpu7x:2x2x1
jax: 0.10.0
libtpu: 0.0.40
codegen_flags: <defaults>
</compile_context>

<pallas_src>
import functools
import math

import jax
import jax.numpy as jnp
from jax.experimental import pallas as pl
from jax.experimental.pallas import tpu as pltpu

# ---------------- synthetic "config" (small DistilBERT-like) ----------------
VOCAB = 100
MAX_POS = 16
DIM = 32            # config.dim
N_HEADS = 4
HEAD_DIM = DIM // N_HEADS
FFN_DIM = 64        # config.hidden_dim
N_LAYERS = 2
NUM_CLASSES = 3
CLS_PAD = 128       # lane-dense padded logits width
LN_EPS = 1e-12
NEG_BIG = -1e9      # finite mask bias (avoids NaN risk of finfo.min)


# ----------------------------- in-kernel helpers ------------------------------
def _layernorm(x, g, b):
    mean = jnp.mean(x, axis=-1, keepdims=True)
    xc = x - mean
    var = jnp.mean(xc * xc, axis=-1, keepdims=True)
    return xc * jax.lax.rsqrt(var + LN_EPS) * g + b


def _softmax_rows(s):
    s = s - jnp.max(s, axis=-1, keepdims=True)
    p = jnp.exp(s)
    return p * pl.reciprocal(jnp.sum(p, axis=-1, keepdims=True), approx=True)


# ------------------------------ fused kernel ----------------------------------
def _bert_kernel(mask_ref, x_ref,
                 emb_g_ref, emb_b_ref,
                 wqkv_ref, bqkv_ref, wo_ref, bo_ref,
                 ln1_g_ref, ln1_b_ref,
                 w1_ref, b1_ref, w2_ref, b2_ref,
                 ln2_g_ref, ln2_b_ref,
                 pre_w_ref, pre_b_ref, cls_w_ref, cls_b_ref,
                 o_ref, *, seqs, seq_len):
    """One grid step == `seqs` sequences folded into one (seqs*S, DIM) slab."""
    tokens = seqs * seq_len

    # Block-diagonal additive attention bias; broadcast over heads ONCE and
    # reuse in every layer (JAX does not CSE broadcast_in_dim).
    mbias = mask_ref[0]                                             # (T, T) f32
    mbias_h = jnp.broadcast_to(mbias[None, :, :],
                               (N_HEADS, tokens, tokens))           # (H, T, T)

    # Embedding LayerNorm.
    x = _layernorm(x_ref[0], emb_g_ref[...], emb_b_ref[...])        # (T, DIM) f32

    for l in range(N_LAYERS):                                       # unrolled
        # ---- fused QKV projection (1/sqrt(Dh) pre-folded into Q columns) ----
        qkv = jnp.dot(x.astype(jnp.bfloat16), wqkv_ref[l],
                      preferred_element_type=jnp.float32) + bqkv_ref[l]
        qkv_bf = qkv.astype(jnp.bfloat16)                            # cast once

        # Head-batched views (H, T, Dh): stack lane slices along a new leading
        # (batch) axis so attention runs as batched einsums + ONE softmax.
        def heads(off):
            return jnp.stack(
                [qkv_bf[:, off + h * HEAD_DIM: off + (h + 1) * HEAD_DIM]
                 for h in range(N_HEADS)], axis=0)
        q = heads(0)
        k = heads(DIM)
        v = heads(2 * DIM)

        s = jnp.einsum('hqd,hkd->hqk', q, k,
                       preferred_element_type=jnp.float32) + mbias_h  # (H,T,T)
        p = _softmax_rows(s).astype(jnp.bfloat16)
        ctx = jnp.einsum('hqk,hkd->hqd', p, v,
                         preferred_element_type=jnp.float32)          # (H,T,Dh)
        ctx = ctx.astype(jnp.bfloat16)                                # cast once
        ctx = jnp.concatenate([ctx[h] for h in range(N_HEADS)], axis=-1)  # (T,DIM)

        # ---- attention output projection + post-LN (DistilBERT layout) ----
        sa = jnp.dot(ctx, wo_ref[l],
                     preferred_element_type=jnp.float32) + bo_ref[l]
        x = _layernorm(sa + x, ln1_g_ref[l], ln1_b_ref[l])

        # ---- FFN ----
        ff = jnp.dot(x.astype(jnp.bfloat16), w1_ref[l],
                     preferred_element_type=jnp.float32) + b1_ref[l]
        # TODO(synk): HF DistilBERT uses exact erf-GELU; tanh approximation here.
        ff = jax.nn.gelu(ff, approximate=True)
        ff = jnp.dot(ff.astype(jnp.bfloat16), w2_ref[l],
                     preferred_element_type=jnp.float32) + b2_ref[l]
        x = _layernorm(ff + x, ln2_g_ref[l], ln2_b_ref[l])

    # ---- classification head (dropout == identity in eval), CLS rows only ----
    cls_tok = jnp.concatenate(
        [x[g * seq_len: g * seq_len + 1, :] for g in range(seqs)], axis=0)  # (G,DIM)
    h = jnp.dot(cls_tok.astype(jnp.bfloat16), pre_w_ref[...],
                preferred_element_type=jnp.float32) + pre_b_ref[...]
    h = jnp.maximum(h, 0.0).astype(jnp.bfloat16)
    logits = jnp.dot(h, cls_w_ref[...],
                     preferred_element_type=jnp.float32) + cls_b_ref[...]    # (G,128)
    o_ref[...] = logits.reshape(1, seqs, CLS_PAD)


# ------------------------------- model glue -----------------------------------
def _num_parallel_blocks(batch):
    # v7x has 2 TensorCores/chip -> keep a 2-wide "parallel" grid axis so
    # megacore sharding engages; on single-TC v5e/v6e fold everything into ONE
    # grid step (per-step overhead ~0.35us dominates at this size).
    try:
        kind = jax.devices()[0].device_kind.lower()
    except Exception:
        kind = ""
    return 2 if ("v7" in kind and batch % 2 == 0) else 1


def bert_text_classifier(params, input_ids, attention_mask):
    if attention_mask is None:
        raise AssertionError("Attension Mask is None")
    B, S = input_ids.shape

    nb = _num_parallel_blocks(B)      # grid steps
    G = B // nb                       # sequences folded into each grid step
    T = G * S                         # token rows per grid step

    # Embedding gather + positional add: kept as XLA glue (gather has no cheap
    # Pallas equivalent at this size).
    word = jnp.take(params["word_emb"], input_ids, axis=0)            # (B, S, D)
    pos = params["pos_emb"][:S]
    x = (word + pos[None, :, :]).astype(jnp.float32).reshape(nb, T, DIM)

    # Block-diagonal additive attention bias: a key contributes only if it is
    # unmasked AND belongs to the same sequence as the query (batch fold must
    # not attend across sequences).
    am = attention_mask.astype(jnp.float32).reshape(nb, T)            # key mask
    key_bias = (1.0 - am) * NEG_BIG                                   # (nb, T)
    seq_id = jnp.arange(T, dtype=jnp.int32) // S
    cross_bias = jnp.where(seq_id[:, None] == seq_id[None, :], 0.0, NEG_BIG)
    mask_bias = key_bias[:, None, :] + cross_bias[None, :, :]         # (nb, T, T)

    full = lambda shp: pl.BlockSpec(shp, lambda b: (0,) * len(shp))
    in_specs = [
        pl.BlockSpec((1, T, T), lambda b: (b, 0, 0)),     # mask bias (per block)
        pl.BlockSpec((1, T, DIM), lambda b: (b, 0, 0)),   # token slab (per block)
        full((1, DIM)), full((1, DIM)),                   # embedding LN
        full((N_LAYERS, DIM, 3 * DIM)), full((N_LAYERS, 1, 3 * DIM)),   # QKV
        full((N_LAYERS, DIM, DIM)), full((N_LAYERS, 1, DIM)),           # out proj
        full((N_LAYERS, 1, DIM)), full((N_LAYERS, 1, DIM)),             # LN1
        full((N_LAYERS, DIM, FFN_DIM)), full((N_LAYERS, 1, FFN_DIM)),   # FFN in
        full((N_LAYERS, FFN_DIM, DIM)), full((N_LAYERS, 1, DIM)),       # FFN out
        full((N_LAYERS, 1, DIM)), full((N_LAYERS, 1, DIM)),             # LN2
        full((DIM, DIM)), full((1, DIM)),                 # pre_classifier
        full((DIM, CLS_PAD)), full((1, CLS_PAD)),         # classifier (lane-padded)
    ]

    kernel = functools.partial(_bert_kernel, seqs=G, seq_len=S)
    logits_pad = pl.pallas_call(
        kernel,
        out_shape=jax.ShapeDtypeStruct((nb, G, CLS_PAD), jnp.float32),
        grid=(nb,),
        in_specs=in_specs,
        out_specs=pl.BlockSpec((1, G, CLS_PAD), lambda b: (b, 0, 0)),
        compiler_params=pltpu.CompilerParams(
            dimension_semantics=("parallel",)),
    )(mask_bias, x,
      params["emb_ln_g"], params["emb_ln_b"],
      params["wqkv"], params["bqkv"], params["wo"], params["bo"],
      params["ln1_g"], params["ln1_b"],
      params["w1"], params["b1"], params["w2"], params["b2"],
      params["ln2_g"], params["ln2_b"],
      params["pre_w"], params["pre_b"],
      params["cls_w_pad"], params["cls_b_pad"])

    return logits_pad.reshape(B, CLS_PAD)[:, :NUM_CLASSES]             # (B, C)


# ------------------------------ param init ------------------------------------
def init_params(key):
    keys = iter(jax.random.split(key, 64))
    nrm = lambda shape: 0.02 * jax.random.normal(next(keys), shape, jnp.float32)
    bf = lambda a: a.astype(jnp.bfloat16)   # matmul weights stored bf16

    # Fold the 1/sqrt(HEAD_DIM) attention scale into the Q weight columns
    # (and, if they were nonzero, the Q bias) at init time.
    scale = 1.0 / math.sqrt(HEAD_DIM)
    wq = jnp.stack([nrm((DIM, DIM)) for _ in range(N_LAYERS)]) * scale
    wk = jnp.stack([nrm((DIM, DIM)) for _ in range(N_LAYERS)])
    wv = jnp.stack([nrm((DIM, DIM)) for _ in range(N_LAYERS)])
    cls_w = nrm((DIM, NUM_CLASSES))

    params = {
        "word_emb": nrm((VOCAB, DIM)),
        "pos_emb": nrm((MAX_POS, DIM)),
        "emb_ln_g": jnp.ones((1, DIM), jnp.float32),
        "emb_ln_b": jnp.zeros((1, DIM), jnp.float32),
        # fused QKV weights/biases (Q columns pre-scaled)
        "wqkv": bf(jnp.concatenate([wq, wk, wv], axis=-1)),   # (L, DIM, 3*DIM)
        "bqkv": jnp.zeros((N_LAYERS, 1, 3 * DIM), jnp.float32),
        "wo": bf(jnp.stack([nrm((DIM, DIM)) for _ in range(N_LAYERS)])),
        "bo": jnp.zeros((N_LAYERS, 1, DIM), jnp.float32),
        "ln1_g": jnp.ones((N_LAYERS, 1, DIM), jnp.float32),
        "ln1_b": jnp.zeros((N_LAYERS, 1, DIM), jnp.float32),
        "w1": bf(jnp.stack([nrm((DIM, FFN_DIM)) for _ in range(N_LAYERS)])),
        "b1": jnp.zeros((N_LAYERS, 1, FFN_DIM), jnp.float32),
        "w2": bf(jnp.stack([nrm((FFN_DIM, DIM)) for _ in range(N_LAYERS)])),
        "b2": jnp.zeros((N_LAYERS, 1, DIM), jnp.float32),
        "ln2_g": jnp.ones((N_LAYERS, 1, DIM), jnp.float32),
        "ln2_b": jnp.zeros((N_LAYERS, 1, DIM), jnp.float32),
        "pre_w": bf(nrm((DIM, DIM))),
        "pre_b": jnp.zeros((1, DIM), jnp.float32),
        # classifier weight lane-padded NUM_CLASSES -> CLS_PAD (zeros sliced off)
        "cls_w_pad": bf(jnp.pad(cls_w, ((0, 0), (0, CLS_PAD - NUM_CLASSES)))),
        "cls_b_pad": jnp.zeros((1, CLS_PAD), jnp.float32),
    }
    return params


if __name__ == "__main__":
    key = jax.random.PRNGKey(0)
    pkey, ikey = jax.random.split(key)
    params = init_params(pkey)

    B, S = 2, 8
    input_ids = jax.random.randint(ikey, (B, S), 0, VOCAB, dtype=jnp.int32)
    attention_mask = jnp.array(
        [[1, 1, 1, 1, 1, 1, 0, 0],
         [1, 1, 1, 1, 0, 0, 0, 0]], dtype=jnp.int32)

    logits = jax.jit(bert_text_classifier)(params, input_ids, attention_mask)
    logits = jax.block_until_ready(logits)
    assert logits.shape == (B, NUM_CLASSES) and logits.dtype == jnp.float32
    print("KERNEL_OK")
</pallas_src>

<mosaic_0001>
module attributes {stable_mosaic.version = 11 : i64} {
  func.func @_bert_kernel(%arg0: i32, %arg1: memref<1x16x16xf32, #tpu.memory_space<vmem>>, %arg2: memref<1x16x32xf32, #tpu.memory_space<vmem>>, %arg3: memref<1x32xf32, #tpu.memory_space<vmem>>, %arg4: memref<1x32xf32, #tpu.memory_space<vmem>>, %arg5: memref<2x32x96xbf16, #tpu.memory_space<vmem>>, %arg6: memref<2x1x96xf32, #tpu.memory_space<vmem>>, %arg7: memref<2x32x32xbf16, #tpu.memory_space<vmem>>, %arg8: memref<2x1x32xf32, #tpu.memory_space<vmem>>, %arg9: memref<2x1x32xf32, #tpu.memory_space<vmem>>, %arg10: memref<2x1x32xf32, #tpu.memory_space<vmem>>, %arg11: memref<2x32x64xbf16, #tpu.memory_space<vmem>>, %arg12: memref<2x1x64xf32, #tpu.memory_space<vmem>>, %arg13: memref<2x64x32xbf16, #tpu.memory_space<vmem>>, %arg14: memref<2x1x32xf32, #tpu.memory_space<vmem>>, %arg15: memref<2x1x32xf32, #tpu.memory_space<vmem>>, %arg16: memref<2x1x32xf32, #tpu.memory_space<vmem>>, %arg17: memref<32x32xbf16, #tpu.memory_space<vmem>>, %arg18: memref<1x32xf32, #tpu.memory_space<vmem>>, %arg19: memref<32x128xbf16, #tpu.memory_space<vmem>>, %arg20: memref<1x128xf32, #tpu.memory_space<vmem>>, %arg21: memref<1x2x128xf32, #tpu.memory_space<vmem>>) attributes {dimension_semantics = [#tpu.dimension_semantics<parallel>], iteration_bounds = array<i64: 1>, scalar_prefetch = 0 : i64, scratch_operands = 0 : i64, tpu.core_type = #tpu.core_type<tc>, window_params = [{transform_indices = @transform_0, window_bounds = array<i64: 1, 16, 16>}, {transform_indices = @transform_1, window_bounds = array<i64: 1, 16, 32>}, {pipeline_mode = #tpu.pipeline_mode<synchronous>, transform_indices = @transform_2, window_bounds = array<i64: 1, 32>}, {pipeline_mode = #tpu.pipeline_mode<synchronous>, transform_indices = @transform_3, window_bounds = array<i64: 1, 32>}, {pipeline_mode = #tpu.pipeline_mode<synchronous>, transform_indices = @transform_4, window_bounds = array<i64: 2, 32, 96>}, {pipeline_mode = #tpu.pipeline_mode<synchronous>, transform_indices = @transform_5, window_bounds = array<i64: 2, 1, 96>}, {pipeline_mode = #tpu.pipeline_mode<synchronous>, transform_indices = @transform_6, window_bounds = array<i64: 2, 32, 32>}, {pipeline_mode = #tpu.pipeline_mode<synchronous>, transform_indices = @transform_7, window_bounds = array<i64: 2, 1, 32>}, {pipeline_mode = #tpu.pipeline_mode<synchronous>, transform_indices = @transform_8, window_bounds = array<i64: 2, 1, 32>}, {pipeline_mode = #tpu.pipeline_mode<synchronous>, transform_indices = @transform_9, window_bounds = array<i64: 2, 1, 32>}, {pipeline_mode = #tpu.pipeline_mode<synchronous>, transform_indices = @transform_10, window_bounds = array<i64: 2, 32, 64>}, {pipeline_mode = #tpu.pipeline_mode<synchronous>, transform_indices = @transform_11, window_bounds = array<i64: 2, 1, 64>}, {pipeline_mode = #tpu.pipeline_mode<synchronous>, transform_indices = @transform_12, window_bounds = array<i64: 2, 64, 32>}, {pipeline_mode = #tpu.pipeline_mode<synchronous>, transform_indices = @transform_13, window_bounds = array<i64: 2, 1, 32>}, {pipeline_mode = #tpu.pipeline_mode<synchronous>, transform_indices = @transform_14, window_bounds = array<i64: 2, 1, 32>}, {pipeline_mode = #tpu.pipeline_mode<synchronous>, transform_indices = @transform_15, window_bounds = array<i64: 2, 1, 32>}, {pipeline_mode = #tpu.pipeline_mode<synchronous>, transform_indices = @transform_16, window_bounds = array<i64: 32, 32>}, {pipeline_mode = #tpu.pipeline_mode<synchronous>, transform_indices = @transform_17, window_bounds = array<i64: 1, 32>}, {pipeline_mode = #tpu.pipeline_mode<synchronous>, transform_indices = @transform_18, window_bounds = array<i64: 32, 128>}, {pipeline_mode = #tpu.pipeline_mode<synchronous>, transform_indices = @transform_19, window_bounds = array<i64: 1, 128>}, {transform_indices = @transform_20, window_bounds = array<i64: 1, 2, 128>}]} {
    %c0 = arith.constant 0 : index
    %c0_0 = arith.constant 0 : index
    %c0_1 = arith.constant 0 : index
    %0 = vector.load %arg1[%c0, %c0_0, %c0_1] : memref<1x16x16xf32, #tpu.memory_space<vmem>>, vector<1x16x16xf32>
    %1 = vector.shape_cast %0 : vector<1x16x16xf32> to vector<16x16xf32>
    %2 = vector.shape_cast %1 : vector<16x16xf32> to vector<1x16x16xf32>
    %3 = vector.shape_cast %2 : vector<1x16x16xf32> to vector<1x16x16xf32>
    %4 = vector.broadcast %3 : vector<1x16x16xf32> to vector<4x16x16xf32>
    %c0_2 = arith.constant 0 : index
    %c0_3 = arith.constant 0 : index
    %c0_4 = arith.constant 0 : index
    %5 = vector.load %arg2[%c0_2, %c0_3, %c0_4] : memref<1x16x32xf32, #tpu.memory_space<vmem>>, vector<1x16x32xf32>
    %6 = vector.shape_cast %5 : vector<1x16x32xf32> to vector<16x32xf32>
    %c0_5 = arith.constant 0 : index
    %c0_6 = arith.constant 0 : index
    %7 = vector.load %arg3[%c0_5, %c0_6] : memref<1x32xf32, #tpu.memory_space<vmem>>, vector<1x32xf32>
    %c0_7 = arith.constant 0 : index
    %c0_8 = arith.constant 0 : index
    %8 = vector.load %arg4[%c0_7, %c0_8] : memref<1x32xf32, #tpu.memory_space<vmem>>, vector<1x32xf32>
    %cst = arith.constant dense<0.000000e+00> : vector<16xf32>
    %9 = vector.multi_reduction <add>, %6, %cst [1] : vector<16x32xf32> to vector<16xf32>
    %10 = vector.shape_cast %9 : vector<16xf32> to vector<16x1xf32>
    %cst_9 = arith.constant 3.200000e+01 : f32
    %11 = vector.broadcast %cst_9 : f32 to vector<16x1xf32>
    %12 = arith.divf %10, %11 : vector<16x1xf32>
    %13 = vector.broadcast %12 : vector<16x1xf32> to vector<16x32xf32>
    %14 = arith.subf %6, %13 : vector<16x32xf32>
    %15 = arith.mulf %14, %14 : vector<16x32xf32>
    %cst_10 = arith.constant dense<0.000000e+00> : vector<16xf32>
    %16 = vector.multi_reduction <add>, %15, %cst_10 [1] : vector<16x32xf32> to vector<16xf32>
    %17 = vector.shape_cast %16 : vector<16xf32> to vector<16x1xf32>
    %cst_11 = arith.constant 3.200000e+01 : f32
    %18 = vector.broadcast %cst_11 : f32 to vector<16x1xf32>
    %19 = arith.divf %17, %18 : vector<16x1xf32>
    %cst_12 = arith.constant 9.99999996E-13 : f32
    %20 = vector.broadcast %cst_12 : f32 to vector<16x1xf32>
    %21 = arith.addf %19, %20 : vector<16x1xf32>
    %22 = math.rsqrt %21 : vector<16x1xf32>
    %23 = vector.broadcast %22 : vector<16x1xf32> to vector<16x32xf32>
    %24 = arith.mulf %14, %23 : vector<16x32xf32>
    %25 = vector.broadcast %7 : vector<1x32xf32> to vector<16x32xf32>
    %26 = arith.mulf %24, %25 : vector<16x32xf32>
    %27 = vector.broadcast %8 : vector<1x32xf32> to vector<16x32xf32>
    %28 = arith.addf %26, %27 : vector<16x32xf32>
    %29 = arith.truncf %28 : vector<16x32xf32> to vector<16x32xbf16>
    %c0_13 = arith.constant 0 : index
    %c0_14 = arith.constant 0 : index
    %c0_15 = arith.constant 0 : index
    %30 = vector.load %arg5[%c0_13, %c0_14, %c0_15] : memref<2x32x96xbf16, #tpu.memory_space<vmem>>, vector<1x32x96xbf16>
    %31 = vector.shape_cast %30 : vector<1x32x96xbf16> to vector<32x96xbf16>
    %cst_16 = arith.constant dense<0.000000e+00> : vector<16x96xf32>
    %32 = tpu.matmul %29, %31, %cst_16 {dimension_numbers = #tpu.dot_dimension_numbers<[1], [0], [0], [1], [0, 0, 1, 1], [], []>} : vector<16x32xbf16>, vector<32x96xbf16>, vector<16x96xf32> -> vector<16x96xf32>
    %c0_17 = arith.constant 0 : index
    %c0_18 = arith.constant 0 : index
    %c0_19 = arith.constant 0 : index
    %33 = vector.load %arg6[%c0_17, %c0_18, %c0_19] : memref<2x1x96xf32, #tpu.memory_space<vmem>>, vector<1x1x96xf32>
    %34 = vector.shape_cast %33 : vector<1x1x96xf32> to vector<1x96xf32>
    %35 = vector.broadcast %34 : vector<1x96xf32> to vector<16x96xf32>
    %36 = arith.addf %32, %35 : vector<16x96xf32>
    %37 = arith.truncf %36 : vector<16x96xf32> to vector<16x96xbf16>
    %38 = vector.extract_strided_slice %37 {offsets = [0, 0], sizes = [16, 8], strides = [1, 1]} : vector<16x96xbf16> to vector<16x8xbf16>
    %39 = vector.extract_strided_slice %37 {offsets = [0, 8], sizes = [16, 8], strides = [1, 1]} : vector<16x96xbf16> to vector<16x8xbf16>
    %40 = vector.extract_strided_slice %37 {offsets = [0, 16], sizes = [16, 8], strides = [1, 1]} : vector<16x96xbf16> to vector<16x8xbf16>
    %41 = vector.extract_strided_slice %37 {offsets = [0, 24], sizes = [16, 8], strides = [1, 1]} : vector<16x96xbf16> to vector<16x8xbf16>
    %42 = vector.shape_cast %38 : vector<16x8xbf16> to vector<1x16x8xbf16>
    %43 = vector.shape_cast %39 : vector<16x8xbf16> to vector<1x16x8xbf16>
    %44 = vector.shape_cast %40 : vector<16x8xbf16> to vector<1x16x8xbf16>
    %45 = vector.shape_cast %41 : vector<16x8xbf16> to vector<1x16x8xbf16>
    %46 = tpu.concatenate %42, %43, %44, %45 in 0 : vector<1x16x8xbf16>, vector<1x16x8xbf16>, vector<1x16x8xbf16>, vector<1x16x8xbf16> -> vector<4x16x8xbf16>
    %47 = vector.extract_strided_slice %37 {offsets = [0, 32], sizes = [16, 8], strides = [1, 1]} : vector<16x96xbf16> to vector<16x8xbf16>
    %48 = vector.extract_strided_slice %37 {offsets = [0, 40], sizes = [16, 8], strides = [1, 1]} : vector<16x96xbf16> to vector<16x8xbf16>
    %49 = vector.extract_strided_slice %37 {offsets = [0, 48], sizes = [16, 8], strides = [1, 1]} : vector<16x96xbf16> to vector<16x8xbf16>
    %50 = vector.extract_strided_slice %37 {offsets = [0, 56], sizes = [16, 8], strides = [1, 1]} : vector<16x96xbf16> to vector<16x8xbf16>
    %51 = vector.shape_cast %47 : vector<16x8xbf16> to vector<1x16x8xbf16>
    %52 = vector.shape_cast %48 : vector<16x8xbf16> to vector<1x16x8xbf16>
    %53 = vector.shape_cast %49 : vector<16x8xbf16> to vector<1x16x8xbf16>
    %54 = vector.shape_cast %50 : vector<16x8xbf16> to vector<1x16x8xbf16>
    %55 = tpu.concatenate %51, %52, %53, %54 in 0 : vector<1x16x8xbf16>, vector<1x16x8xbf16>, vector<1x16x8xbf16>, vector<1x16x8xbf16> -> vector<4x16x8xbf16>
    %56 = vector.extract_strided_slice %37 {offsets = [0, 64], sizes = [16, 8], strides = [1, 1]} : vector<16x96xbf16> to vector<16x8xbf16>
    %57 = vector.extract_strided_slice %37 {offsets = [0, 72], sizes = [16, 8], strides = [1, 1]} : vector<16x96xbf16> to vector<16x8xbf16>
    %58 = vector.extract_strided_slice %37 {offsets = [0, 80], sizes = [16, 8], strides = [1, 1]} : vector<16x96xbf16> to vector<16x8xbf16>
    %59 = vector.extract_strided_slice %37 {offsets = [0, 88], sizes = [16, 8], strides = [1, 1]} : vector<16x96xbf16> to vector<16x8xbf16>
    %60 = vector.shape_cast %56 : vector<16x8xbf16> to vector<1x16x8xbf16>
    %61 = vector.shape_cast %57 : vector<16x8xbf16> to vector<1x16x8xbf16>
    %62 = vector.shape_cast %58 : vector<16x8xbf16> to vector<1x16x8xbf16>
    %63 = vector.shape_cast %59 : vector<16x8xbf16> to vector<1x16x8xbf16>
    %64 = tpu.concatenate %60, %61, %62, %63 in 0 : vector<1x16x8xbf16>, vector<1x16x8xbf16>, vector<1x16x8xbf16>, vector<1x16x8xbf16> -> vector<4x16x8xbf16>
    "tpu.trace_start"() <{level = 10 : i32, message = "hqd,hkd->hqk"}> : () -> ()
    %cst_20 = arith.constant dense<0.000000e+00> : vector<4x16x16xf32>
    %65 = tpu.matmul %46, %55, %cst_20 {dimension_numbers = #tpu.dot_dimension_numbers<[2], [2], [1], [1], [0, 0, 0, 1, 1, 1], [0], [0]>} : vector<4x16x8xbf16>, vector<4x16x8xbf16>, vector<4x16x16xf32> -> vector<4x16x16xf32>
    "tpu.trace_stop"() : () -> ()
    %66 = arith.addf %65, %4 : vector<4x16x16xf32>
    %cst_21 = arith.constant dense<0xFF800000> : vector<4x16xf32>
    %67 = vector.multi_reduction <maximumf>, %66, %cst_21 [2] : vector<4x16x16xf32> to vector<4x16xf32>
    %68 = vector.shape_cast %67 : vector<4x16xf32> to vector<4x16x1xf32>
    %69 = vector.broadcast %68 : vector<4x16x1xf32> to vector<4x16x16xf32>
    %70 = arith.subf %66, %69 : vector<4x16x16xf32>
    %71 = math.exp %70 : vector<4x16x16xf32>
    %cst_22 = arith.constant dense<0.000000e+00> : vector<4x16xf32>
    %72 = vector.multi_reduction <add>, %71, %cst_22 [2] : vector<4x16x16xf32> to vector<4x16xf32>
    %73 = vector.shape_cast %72 : vector<4x16xf32> to vector<4x16x1xf32>
    %74 = tpu.reciprocal %73 {approx = true} : vector<4x16x1xf32> -> vector<4x16x1xf32>
    %75 = vector.broadcast %74 : vector<4x16x1xf32> to vector<4x16x16xf32>
    %76 = arith.mulf %71, %75 : vector<4x16x16xf32>
    %77 = arith.truncf %76 : vector<4x16x16xf32> to vector<4x16x16xbf16>
    "tpu.trace_start"() <{level = 10 : i32, message = "hqk,hkd->hqd"}> : () -> ()
    %cst_23 = arith.constant dense<0.000000e+00> : vector<4x16x8xf32>
    %78 = tpu.matmul %77, %64, %cst_23 {dimension_numbers = #tpu.dot_dimension_numbers<[2], [1], [1], [2], [0, 0, 0, 1, 1, 2], [0], [0]>} : vector<4x16x16xbf16>, vector<4x16x8xbf16>, vector<4x16x8xf32> -> vector<4x16x8xf32>
    "tpu.trace_stop"() : () -> ()
    %79 = arith.truncf %78 : vector<4x16x8xf32> to vector<4x16x8xbf16>
    %80 = vector.extract_strided_slice %79 {offsets = [0, 0, 0], sizes = [1, 16, 8], strides = [1, 1, 1]} : vector<4x16x8xbf16> to vector<1x16x8xbf16>
    %81 = vector.shape_cast %80 : vector<1x16x8xbf16> to vector<16x8xbf16>
    %82 = vector.extract_strided_slice %79 {offsets = [1, 0, 0], sizes = [1, 16, 8], strides = [1, 1, 1]} : vector<4x16x8xbf16> to vector<1x16x8xbf16>
    %83 = vector.shape_cast %82 : vector<1x16x8xbf16> to vector<16x8xbf16>
    %84 = vector.extract_strided_slice %79 {offsets = [2, 0, 0], sizes = [1, 16, 8], strides = [1, 1, 1]} : vector<4x16x8xbf16> to vector<1x16x8xbf16>
    %85 = vector.shape_cast %84 : vector<1x16x8xbf16> to vector<16x8xbf16>
    %86 = vector.extract_strided_slice %79 {offsets = [3, 0, 0], sizes = [1, 16, 8], strides = [1, 1, 1]} : vector<4x16x8xbf16> to vector<1x16x8xbf16>
    %87 = vector.shape_cast %86 : vector<1x16x8xbf16> to vector<16x8xbf16>
    %88 = tpu.concatenate %81, %83, %85, %87 in 1 : vector<16x8xbf16>, vector<16x8xbf16>, vector<16x8xbf16>, vector<16x8xbf16> -> vector<16x32xbf16>
    %c0_24 = arith.constant 0 : index
    %c0_25 = arith.constant 0 : index
    %c0_26 = arith.constant 0 : index
    %89 = vector.load %arg7[%c0_24, %c0_25, %c0_26] : memref<2x32x32xbf16, #tpu.memory_space<vmem>>, vector<1x32x32xbf16>
    %90 = vector.shape_cast %89 : vector<1x32x32xbf16> to vector<32x32xbf16>
    %cst_27 = arith.constant dense<0.000000e+00> : vector<16x32xf32>
    %91 = tpu.matmul %88, %90, %cst_27 {dimension_numbers = #tpu.dot_dimension_numbers<[1], [0], [0], [1], [0, 0, 1, 1], [], []>} : vector<16x32xbf16>, vector<32x32xbf16>, vector<16x32xf32> -> vector<16x32xf32>
    %c0_28 = arith.constant 0 : index
    %c0_29 = arith.constant 0 : index
    %c0_30 = arith.constant 0 : index
    %92 = vector.load %arg8[%c0_28, %c0_29, %c0_30] : memref<2x1x32xf32, #tpu.memory_space<vmem>>, vector<1x1x32xf32>
    %93 = vector.shape_cast %92 : vector<1x1x32xf32> to vector<1x32xf32>
    %94 = vector.broadcast %93 : vector<1x32xf32> to vector<16x32xf32>
    %95 = arith.addf %91, %94 : vector<16x32xf32>
    %96 = arith.addf %95, %28 : vector<16x32xf32>
    %c0_31 = arith.constant 0 : index
    %c0_32 = arith.constant 0 : index
    %c0_33 = arith.constant 0 : index
    %97 = vector.load %arg9[%c0_31, %c0_32, %c0_33] : memref<2x1x32xf32, #tpu.memory_space<vmem>>, vector<1x1x32xf32>
    %98 = vector.shape_cast %97 : vector<1x1x32xf32> to vector<1x32xf32>
    %c0_34 = arith.constant 0 : index
    %c0_35 = arith.constant 0 : index
    %c0_36 = arith.constant 0 : index
    %99 = vector.load %arg10[%c0_34, %c0_35, %c0_36] : memref<2x1x32xf32, #tpu.memory_space<vmem>>, vector<1x1x32xf32>
    %100 = vector.shape_cast %99 : vector<1x1x32xf32> to vector<1x32xf32>
    %cst_37 = arith.constant dense<0.000000e+00> : vector<16xf32>
    %101 = vector.multi_reduction <add>, %96, %cst_37 [1] : vector<16x32xf32> to vector<16xf32>
    %102 = vector.shape_cast %101 : vector<16xf32> to vector<16x1xf32>
    %cst_38 = arith.constant 3.200000e+01 : f32
    %103 = vector.broadcast %cst_38 : f32 to vector<16x1xf32>
    %104 = arith.divf %102, %103 : vector<16x1xf32>
    %105 = vector.broadcast %104 : vector<16x1xf32> to vector<16x32xf32>
    %106 = arith.subf %96, %105 : vector<16x32xf32>
    %107 = arith.mulf %106, %106 : vector<16x32xf32>
    %cst_39 = arith.constant dense<0.000000e+00> : vector<16xf32>
    %108 = vector.multi_reduction <add>, %107, %cst_39 [1] : vector<16x32xf32> to vector<16xf32>
    %109 = vector.shape_cast %108 : vector<16xf32> to vector<16x1xf32>
    %cst_40 = arith.constant 3.200000e+01 : f32
    %110 = vector.broadcast %cst_40 : f32 to vector<16x1xf32>
    %111 = arith.divf %109, %110 : vector<16x1xf32>
    %cst_41 = arith.constant 9.99999996E-13 : f32
    %112 = vector.broadcast %cst_41 : f32 to vector<16x1xf32>
    %113 = arith.addf %111, %112 : vector<16x1xf32>
    %114 = math.rsqrt %113 : vector<16x1xf32>
    %115 = vector.broadcast %114 : vector<16x1xf32> to vector<16x32xf32>
    %116 = arith.mulf %106, %115 : vector<16x32xf32>
    %117 = vector.broadcast %98 : vector<1x32xf32> to vector<16x32xf32>
    %118 = arith.mulf %116, %117 : vector<16x32xf32>
    %119 = vector.broadcast %100 : vector<1x32xf32> to vector<16x32xf32>
    %120 = arith.addf %118, %119 : vector<16x32xf32>
    %121 = arith.truncf %120 : vector<16x32xf32> to vector<16x32xbf16>
    %c0_42 = arith.constant 0 : index
    %c0_43 = arith.constant 0 : index
    %c0_44 = arith.constant 0 : index
    %122 = vector.load %arg11[%c0_42, %c0_43, %c0_44] : memref<2x32x64xbf16, #tpu.memory_space<vmem>>, vector<1x32x64xbf16>
    %123 = vector.shape_cast %122 : vector<1x32x64xbf16> to vector<32x64xbf16>
    %cst_45 = arith.constant dense<0.000000e+00> : vector<16x64xf32>
    %124 = tpu.matmul %121, %123, %cst_45 {dimension_numbers = #tpu.dot_dimension_numbers<[1], [0], [0], [1], [0, 0, 1, 1], [], []>} : vector<16x32xbf16>, vector<32x64xbf16>, vector<16x64xf32> -> vector<16x64xf32>
    %c0_46 = arith.constant 0 : index
    %c0_47 = arith.constant 0 : index
    %c0_48 = arith.constant 0 : index
    %125 = vector.load %arg12[%c0_46, %c0_47, %c0_48] : memref<2x1x64xf32, #tpu.memory_space<vmem>>, vector<1x1x64xf32>
    %126 = vector.shape_cast %125 : vector<1x1x64xf32> to vector<1x64xf32>
    %127 = vector.broadcast %126 : vector<1x64xf32> to vector<16x64xf32>
    %128 = arith.addf %124, %127 : vector<16x64xf32>
    %129 = arith.mulf %128, %128 : vector<16x64xf32>
    %130 = arith.mulf %128, %129 : vector<16x64xf32>
    %cst_49 = arith.constant 4.471500e-02 : f32
    %131 = vector.broadcast %cst_49 : f32 to vector<16x64xf32>
    %132 = arith.mulf %131, %130 : vector<16x64xf32>
    %133 = arith.addf %128, %132 : vector<16x64xf32>
    %cst_50 = arith.constant 0.797884583 : f32
    %134 = vector.broadcast %cst_50 : f32 to vector<16x64xf32>
    %135 = arith.mulf %134, %133 : vector<16x64xf32>
    %136 = math.tanh %135 : vector<16x64xf32>
    %cst_51 = arith.constant 1.000000e+00 : f32
    %137 = vector.broadcast %cst_51 : f32 to vector<16x64xf32>
    %138 = arith.addf %137, %136 : vector<16x64xf32>
    %cst_52 = arith.constant 5.000000e-01 : f32
    %139 = vector.broadcast %cst_52 : f32 to vector<16x64xf32>
    %140 = arith.mulf %139, %138 : vector<16x64xf32>
    %141 = arith.mulf %128, %140 : vector<16x64xf32>
    %142 = arith.truncf %141 : vector<16x64xf32> to vector<16x64xbf16>
    %c0_53 = arith.constant 0 : index
    %c0_54 = arith.constant 0 : index
    %c0_55 = arith.constant 0 : index
    %143 = vector.load %arg13[%c0_53, %c0_54, %c0_55] : memref<2x64x32xbf16, #tpu.memory_space<vmem>>, vector<1x64x32xbf16>
    %144 = vector.shape_cast %143 : vector<1x64x32xbf16> to vector<64x32xbf16>
    %cst_56 = arith.constant dense<0.000000e+00> : vector<16x32xf32>
    %145 = tpu.matmul %142, %144, %cst_56 {dimension_numbers = #tpu.dot_dimension_numbers<[1], [0], [0], [1], [0, 0, 1, 1], [], []>} : vector<16x64xbf16>, vector<64x32xbf16>, vector<16x32xf32> -> vector<16x32xf32>
    %c0_57 = arith.constant 0 : index
    %c0_58 = arith.constant 0 : index
    %c0_59 = arith.constant 0 : index
    %146 = vector.load %arg14[%c0_57, %c0_58, %c0_59] : memref<2x1x32xf32, #tpu.memory_space<vmem>>, vector<1x1x32xf32>
    %147 = vector.shape_cast %146 : vector<1x1x32xf32> to vector<1x32xf32>
    %148 = vector.broadcast %147 : vector<1x32xf32> to vector<16x32xf32>
    %149 = arith.addf %145, %148 : vector<16x32xf32>
    %150 = arith.addf %149, %120 : vector<16x32xf32>
    %c0_60 = arith.constant 0 : index
    %c0_61 = arith.constant 0 : index
    %c0_62 = arith.constant 0 : index
    %151 = vector.load %arg15[%c0_60, %c0_61, %c0_62] : memref<2x1x32xf32, #tpu.memory_space<vmem>>, vector<1x1x32xf32>
    %152 = vector.shape_cast %151 : vector<1x1x32xf32> to vector<1x32xf32>
    %c0_63 = arith.constant 0 : index
    %c0_64 = arith.constant 0 : index
    %c0_65 = arith.constant 0 : index
    %153 = vector.load %arg16[%c0_63, %c0_64, %c0_65] : memref<2x1x32xf32, #tpu.memory_space<vmem>>, vector<1x1x32xf32>
    %154 = vector.shape_cast %153 : vector<1x1x32xf32> to vector<1x32xf32>
    %cst_66 = arith.constant dense<0.000000e+00> : vector<16xf32>
    %155 = vector.multi_reduction <add>, %150, %cst_66 [1] : vector<16x32xf32> to vector<16xf32>
    %156 = vector.shape_cast %155 : vector<16xf32> to vector<16x1xf32>
    %cst_67 = arith.constant 3.200000e+01 : f32
    %157 = vector.broadcast %cst_67 : f32 to vector<16x1xf32>
    %158 = arith.divf %156, %157 : vector<16x1xf32>
    %159 = vector.broadcast %158 : vector<16x1xf32> to vector<16x32xf32>
    %160 = arith.subf %150, %159 : vector<16x32xf32>
    %161 = arith.mulf %160, %160 : vector<16x32xf32>
    %cst_68 = arith.constant dense<0.000000e+00> : vector<16xf32>
    %162 = vector.multi_reduction <add>, %161, %cst_68 [1] : vector<16x32xf32> to vector<16xf32>
    %163 = vector.shape_cast %162 : vector<16xf32> to vector<16x1xf32>
    %cst_69 = arith.constant 3.200000e+01 : f32
    %164 = vector.broadcast %cst_69 : f32 to vector<16x1xf32>
    %165 = arith.divf %163, %164 : vector<16x1xf32>
    %cst_70 = arith.constant 9.99999996E-13 : f32
    %166 = vector.broadcast %cst_70 : f32 to vector<16x1xf32>
    %167 = arith.addf %165, %166 : vector<16x1xf32>
    %168 = math.rsqrt %167 : vector<16x1xf32>
    %169 = vector.broadcast %168 : vector<16x1xf32> to vector<16x32xf32>
    %170 = arith.mulf %160, %169 : vector<16x32xf32>
    %171 = vector.broadcast %152 : vector<1x32xf32> to vector<16x32xf32>
    %172 = arith.mulf %170, %171 : vector<16x32xf32>
    %173 = vector.broadcast %154 : vector<1x32xf32> to vector<16x32xf32>
    %174 = arith.addf %172, %173 : vector<16x32xf32>
    %175 = arith.truncf %174 : vector<16x32xf32> to vector<16x32xbf16>
    %c1 = arith.constant 1 : index
    %c0_71 = arith.constant 0 : index
    %c0_72 = arith.constant 0 : index
    %176 = vector.load %arg5[%c1, %c0_71, %c0_72] : memref<2x32x96xbf16, #tpu.memory_space<vmem>>, vector<1x32x96xbf16>
    %177 = vector.shape_cast %176 : vector<1x32x96xbf16> to vector<32x96xbf16>
    %cst_73 = arith.constant dense<0.000000e+00> : vector<16x96xf32>
    %178 = tpu.matmul %175, %177, %cst_73 {dimension_numbers = #tpu.dot_dimension_numbers<[1], [0], [0], [1], [0, 0, 1, 1], [], []>} : vector<16x32xbf16>, vector<32x96xbf16>, vector<16x96xf32> -> vector<16x96xf32>
    %c1_74 = arith.constant 1 : index
    %c0_75 = arith.constant 0 : index
    %c0_76 = arith.constant 0 : index
    %179 = vector.load %arg6[%c1_74, %c0_75, %c0_76] : memref<2x1x96xf32, #tpu.memory_space<vmem>>, vector<1x1x96xf32>
    %180 = vector.shape_cast %179 : vector<1x1x96xf32> to vector<1x96xf32>
    %181 = vector.broadcast %180 : vector<1x96xf32> to vector<16x96xf32>
    %182 = arith.addf %178, %181 : vector<16x96xf32>
    %183 = arith.truncf %182 : vector<16x96xf32> to vector<16x96xbf16>
    %184 = vector.extract_strided_slice %183 {offsets = [0, 0], sizes = [16, 8], strides = [1, 1]} : vector<16x96xbf16> to vector<16x8xbf16>
    %185 = vector.extract_strided_slice %183 {offsets = [0, 8], sizes = [16, 8], strides = [1, 1]} : vector<16x96xbf16> to vector<16x8xbf16>
    %186 = vector.extract_strided_slice %183 {offsets = [0, 16], sizes = [16, 8], strides = [1, 1]} : vector<16x96xbf16> to vector<16x8xbf16>
    %187 = vector.extract_strided_slice %183 {offsets = [0, 24], sizes = [16, 8], strides = [1, 1]} : vector<16x96xbf16> to vector<16x8xbf16>
    %188 = vector.shape_cast %184 : vector<16x8xbf16> to vector<1x16x8xbf16>
    %189 = vector.shape_cast %185 : vector<16x8xbf16> to vector<1x16x8xbf16>
    %190 = vector.shape_cast %186 : vector<16x8xbf16> to vector<1x16x8xbf16>
    %191 = vector.shape_cast %187 : vector<16x8xbf16> to vector<1x16x8xbf16>
    %192 = tpu.concatenate %188, %189, %190, %191 in 0 : vector<1x16x8xbf16>, vector<1x16x8xbf16>, vector<1x16x8xbf16>, vector<1x16x8xbf16> -> vector<4x16x8xbf16>
    %193 = vector.extract_strided_slice %183 {offsets = [0, 32], sizes = [16, 8], strides = [1, 1]} : vector<16x96xbf16> to vector<16x8xbf16>
    %194 = vector.extract_strided_slice %183 {offsets = [0, 40], sizes = [16, 8], strides = [1, 1]} : vector<16x96xbf16> to vector<16x8xbf16>
    %195 = vector.extract_strided_slice %183 {offsets = [0, 48], sizes = [16, 8], strides = [1, 1]} : vector<16x96xbf16> to vector<16x8xbf16>
    %196 = vector.extract_strided_slice %183 {offsets = [0, 56], sizes = [16, 8], strides = [1, 1]} : vector<16x96xbf16> to vector<16x8xbf16>
    %197 = vector.shape_cast %193 : vector<16x8xbf16> to vector<1x16x8xbf16>
    %198 = vector.shape_cast %194 : vector<16x8xbf16> to vector<1x16x8xbf16>
    %199 = vector.shape_cast %195 : vector<16x8xbf16> to vector<1x16x8xbf16>
    %200 = vector.shape_cast %196 : vector<16x8xbf16> to vector<1x16x8xbf16>
    %201 = tpu.concatenate %197, %198, %199, %200 in 0 : vector<1x16x8xbf16>, vector<1x16x8xbf16>, vector<1x16x8xbf16>, vector<1x16x8xbf16> -> vector<4x16x8xbf16>
    %202 = vector.extract_strided_slice %183 {offsets = [0, 64], sizes = [16, 8], strides = [1, 1]} : vector<16x96xbf16> to vector<16x8xbf16>
    %203 = vector.extract_strided_slice %183 {offsets = [0, 72], sizes = [16, 8], strides = [1, 1]} : vector<16x96xbf16> to vector<16x8xbf16>
    %204 = vector.extract_strided_slice %183 {offsets = [0, 80], sizes = [16, 8], strides = [1, 1]} : vector<16x96xbf16> to vector<16x8xbf16>
    %205 = vector.extract_strided_slice %183 {offsets = [0, 88], sizes = [16, 8], strides = [1, 1]} : vector<16x96xbf16> to vector<16x8xbf16>
    %206 = vector.shape_cast %202 : vector<16x8xbf16> to vector<1x16x8xbf16>
    %207 = vector.shape_cast %203 : vector<16x8xbf16> to vector<1x16x8xbf16>
    %208 = vector.shape_cast %204 : vector<16x8xbf16> to vector<1x16x8xbf16>
    %209 = vector.shape_cast %205 : vector<16x8xbf16> to vector<1x16x8xbf16>
    %210 = tpu.concatenate %206, %207, %208, %209 in 0 : vector<1x16x8xbf16>, vector<1x16x8xbf16>, vector<1x16x8xbf16>, vector<1x16x8xbf16> -> vector<4x16x8xbf16>
    "tpu.trace_start"() <{level = 10 : i32, message = "hqd,hkd->hqk"}> : () -> ()
    %cst_77 = arith.constant dense<0.000000e+00> : vector<4x16x16xf32>
    %211 = tpu.matmul %192, %201, %cst_77 {dimension_numbers = #tpu.dot_dimension_numbers<[2], [2], [1], [1], [0, 0, 0, 1, 1, 1], [0], [0]>} : vector<4x16x8xbf16>, vector<4x16x8xbf16>, vector<4x16x16xf32> -> vector<4x16x16xf32>
    "tpu.trace_stop"() : () -> ()
    %212 = arith.addf %211, %4 : vector<4x16x16xf32>
    %cst_78 = arith.constant dense<0xFF800000> : vector<4x16xf32>
    %213 = vector.multi_reduction <maximumf>, %212, %cst_78 [2] : vector<4x16x16xf32> to vector<4x16xf32>
    %214 = vector.shape_cast %213 : vector<4x16xf32> to vector<4x16x1xf32>
    %215 = vector.broadcast %214 : vector<4x16x1xf32> to vector<4x16x16xf32>
    %216 = arith.subf %212, %215 : vector<4x16x16xf32>
    %217 = math.exp %216 : vector<4x16x16xf32>
    %cst_79 = arith.constant dense<0.000000e+00> : vector<4x16xf32>
    %218 = vector.multi_reduction <add>, %217, %cst_79 [2] : vector<4x16x16xf32> to vector<4x16xf32>
    %219 = vector.shape_cast %218 : vector<4x16xf32> to vector<4x16x1xf32>
    %220 = tpu.reciprocal %219 {approx = true} : vector<4x16x1xf32> -> vector<4x16x1xf32>
    %221 = vector.broadcast %220 : vector<4x16x1xf32> to vector<4x16x16xf32>
    %222 = arith.mulf %217, %221 : vector<4x16x16xf32>
    %223 = arith.truncf %222 : vector<4x16x16xf32> to vector<4x16x16xbf16>
    "tpu.trace_start"() <{level = 10 : i32, message = "hqk,hkd->hqd"}> : () -> ()
    %cst_80 = arith.constant dense<0.000000e+00> : vector<4x16x8xf32>
    %224 = tpu.matmul %223, %210, %cst_80 {dimension_numbers = #tpu.dot_dimension_numbers<[2], [1], [1], [2], [0, 0, 0, 1, 1, 2], [0], [0]>} : vector<4x16x16xbf16>, vector<4x16x8xbf16>, vector<4x16x8xf32> -> vector<4x16x8xf32>
    "tpu.trace_stop"() : () -> ()
    %225 = arith.truncf %224 : vector<4x16x8xf32> to vector<4x16x8xbf16>
    %226 = vector.extract_strided_slice %225 {offsets = [0, 0, 0], sizes = [1, 16, 8], strides = [1, 1, 1]} : vector<4x16x8xbf16> to vector<1x16x8xbf16>
    %227 = vector.shape_cast %226 : vector<1x16x8xbf16> to vector<16x8xbf16>
    %228 = vector.extract_strided_slice %225 {offsets = [1, 0, 0], sizes = [1, 16, 8], strides = [1, 1, 1]} : vector<4x16x8xbf16> to vector<1x16x8xbf16>
    %229 = vector.shape_cast %228 : vector<1x16x8xbf16> to vector<16x8xbf16>
    %230 = vector.extract_strided_slice %225 {offsets = [2, 0, 0], sizes = [1, 16, 8], strides = [1, 1, 1]} : vector<4x16x8xbf16> to vector<1x16x8xbf16>
    %231 = vector.shape_cast %230 : vector<1x16x8xbf16> to vector<16x8xbf16>
    %232 = vector.extract_strided_slice %225 {offsets = [3, 0, 0], sizes = [1, 16, 8], strides = [1, 1, 1]} : vector<4x16x8xbf16> to vector<1x16x8xbf16>
    %233 = vector.shape_cast %232 : vector<1x16x8xbf16> to vector<16x8xbf16>
    %234 = tpu.concatenate %227, %229, %231, %233 in 1 : vector<16x8xbf16>, vector<16x8xbf16>, vector<16x8xbf16>, vector<16x8xbf16> -> vector<16x32xbf16>
    %c1_81 = arith.constant 1 : index
    %c0_82 = arith.constant 0 : index
    %c0_83 = arith.constant 0 : index
    %235 = vector.load %arg7[%c1_81, %c0_82, %c0_83] : memref<2x32x32xbf16, #tpu.memory_space<vmem>>, vector<1x32x32xbf16>
    %236 = vector.shape_cast %235 : vector<1x32x32xbf16> to vector<32x32xbf16>
    %cst_84 = arith.constant dense<0.000000e+00> : vector<16x32xf32>
    %237 = tpu.matmul %234, %236, %cst_84 {dimension_numbers = #tpu.dot_dimension_numbers<[1], [0], [0], [1], [0, 0, 1, 1], [], []>} : vector<16x32xbf16>, vector<32x32xbf16>, vector<16x32xf32> -> vector<16x32xf32>
    %c1_85 = arith.constant 1 : index
    %c0_86 = arith.constant 0 : index
    %c0_87 = arith.constant 0 : index
    %238 = vector.load %arg8[%c1_85, %c0_86, %c0_87] : memref<2x1x32xf32, #tpu.memory_space<vmem>>, vector<1x1x32xf32>
    %239 = vector.shape_cast %238 : vector<1x1x32xf32> to vector<1x32xf32>
    %240 = vector.broadcast %239 : vector<1x32xf32> to vector<16x32xf32>
    %241 = arith.addf %237, %240 : vector<16x32xf32>
    %242 = arith.addf %241, %174 : vector<16x32xf32>
    %c1_88 = arith.constant 1 : index
    %c0_89 = arith.constant 0 : index
    %c0_90 = arith.constant 0 : index
    %243 = vector.load %arg9[%c1_88, %c0_89, %c0_90] : memref<2x1x32xf32, #tpu.memory_space<vmem>>, vector<1x1x32xf32>
    %244 = vector.shape_cast %243 : vector<1x1x32xf32> to vector<1x32xf32>
    %c1_91 = arith.constant 1 : index
    %c0_92 = arith.constant 0 : index
    %c0_93 = arith.constant 0 : index
    %245 = vector.load %arg10[%c1_91, %c0_92, %c0_93] : memref<2x1x32xf32, #tpu.memory_space<vmem>>, vector<1x1x32xf32>
    %246 = vector.shape_cast %245 : vector<1x1x32xf32> to vector<1x32xf32>
    %cst_94 = arith.constant dense<0.000000e+00> : vector<16xf32>
    %247 = vector.multi_reduction <add>, %242, %cst_94 [1] : vector<16x32xf32> to vector<16xf32>
    %248 = vector.shape_cast %247 : vector<16xf32> to vector<16x1xf32>
    %cst_95 = arith.constant 3.200000e+01 : f32
    %249 = vector.broadcast %cst_95 : f32 to vector<16x1xf32>
    %250 = arith.divf %248, %249 : vector<16x1xf32>
    %251 = vector.broadcast %250 : vector<16x1xf32> to vector<16x32xf32>
    %252 = arith.subf %242, %251 : vector<16x32xf32>
    %253 = arith.mulf %252, %252 : vector<16x32xf32>
    %cst_96 = arith.constant dense<0.000000e+00> : vector<16xf32>
    %254 = vector.multi_reduction <add>, %253, %cst_96 [1] : vector<16x32xf32> to vector<16xf32>
    %255 = vector.shape_cast %254 : vector<16xf32> to vector<16x1xf32>
    %cst_97 = arith.constant 3.200000e+01 : f32
    %256 = vector.broadcast %cst_97 : f32 to vector<16x1xf32>
    %257 = arith.divf %255, %256 : vector<16x1xf32>
    %cst_98 = arith.constant 9.99999996E-13 : f32
    %258 = vector.broadcast %cst_98 : f32 to vector<16x1xf32>
    %259 = arith.addf %257, %258 : vector<16x1xf32>
    %260 = math.rsqrt %259 : vector<16x1xf32>
    %261 = vector.broadcast %260 : vector<16x1xf32> to vector<16x32xf32>
    %262 = arith.mulf %252, %261 : vector<16x32xf32>
    %263 = vector.broadcast %244 : vector<1x32xf32> to vector<16x32xf32>
    %264 = arith.mulf %262, %263 : vector<16x32xf32>
    %265 = vector.broadcast %246 : vector<1x32xf32> to vector<16x32xf32>
    %266 = arith.addf %264, %265 : vector<16x32xf32>
    %267 = arith.truncf %266 : vector<16x32xf32> to vector<16x32xbf16>
    %c1_99 = arith.constant 1 : index
    %c0_100 = arith.constant 0 : index
    %c0_101 = arith.constant 0 : index
    %268 = vector.load %arg11[%c1_99, %c0_100, %c0_101] : memref<2x32x64xbf16, #tpu.memory_space<vmem>>, vector<1x32x64xbf16>
    %269 = vector.shape_cast %268 : vector<1x32x64xbf16> to vector<32x64xbf16>
    %cst_102 = arith.constant dense<0.000000e+00> : vector<16x64xf32>
    %270 = tpu.matmul %267, %269, %cst_102 {dimension_numbers = #tpu.dot_dimension_numbers<[1], [0], [0], [1], [0, 0, 1, 1], [], []>} : vector<16x32xbf16>, vector<32x64xbf16>, vector<16x64xf32> -> vector<16x64xf32>
    %c1_103 = arith.constant 1 : index
    %c0_104 = arith.constant 0 : index
    %c0_105 = arith.constant 0 : index
    %271 = vector.load %arg12[%c1_103, %c0_104, %c0_105] : memref<2x1x64xf32, #tpu.memory_space<vmem>>, vector<1x1x64xf32>
    %272 = vector.shape_cast %271 : vector<1x1x64xf32> to vector<1x64xf32>
    %273 = vector.broadcast %272 : vector<1x64xf32> to vector<16x64xf32>
    %274 = arith.addf %270, %273 : vector<16x64xf32>
    %275 = arith.mulf %274, %274 : vector<16x64xf32>
    %276 = arith.mulf %274, %275 : vector<16x64xf32>
    %cst_106 = arith.constant 4.471500e-02 : f32
    %277 = vector.broadcast %cst_106 : f32 to vector<16x64xf32>
    %278 = arith.mulf %277, %276 : vector<16x64xf32>
    %279 = arith.addf %274, %278 : vector<16x64xf32>
    %cst_107 = arith.constant 0.797884583 : f32
    %280 = vector.broadcast %cst_107 : f32 to vector<16x64xf32>
    %281 = arith.mulf %280, %279 : vector<16x64xf32>
    %282 = math.tanh %281 : vector<16x64xf32>
    %cst_108 = arith.constant 1.000000e+00 : f32
    %283 = vector.broadcast %cst_108 : f32 to vector<16x64xf32>
    %284 = arith.addf %283, %282 : vector<16x64xf32>
    %cst_109 = arith.constant 5.000000e-01 : f32
    %285 = vector.broadcast %cst_109 : f32 to vector<16x64xf32>
    %286 = arith.mulf %285, %284 : vector<16x64xf32>
    %287 = arith.mulf %274, %286 : vector<16x64xf32>
    %288 = arith.truncf %287 : vector<16x64xf32> to vector<16x64xbf16>
    %c1_110 = arith.constant 1 : index
    %c0_111 = arith.constant 0 : index
    %c0_112 = arith.constant 0 : index
    %289 = vector.load %arg13[%c1_110, %c0_111, %c0_112] : memref<2x64x32xbf16, #tpu.memory_space<vmem>>, vector<1x64x32xbf16>
    %290 = vector.shape_cast %289 : vector<1x64x32xbf16> to vector<64x32xbf16>
    %cst_113 = arith.constant dense<0.000000e+00> : vector<16x32xf32>
    %291 = tpu.matmul %288, %290, %cst_113 {dimension_numbers = #tpu.dot_dimension_numbers<[1], [0], [0], [1], [0, 0, 1, 1], [], []>} : vector<16x64xbf16>, vector<64x32xbf16>, vector<16x32xf32> -> vector<16x32xf32>
    %c1_114 = arith.constant 1 : index
    %c0_115 = arith.constant 0 : index
    %c0_116 = arith.constant 0 : index
    %292 = vector.load %arg14[%c1_114, %c0_115, %c0_116] : memref<2x1x32xf32, #tpu.memory_space<vmem>>, vector<1x1x32xf32>
    %293 = vector.shape_cast %292 : vector<1x1x32xf32> to vector<1x32xf32>
    %294 = vector.broadcast %293 : vector<1x32xf32> to vector<16x32xf32>
    %295 = arith.addf %291, %294 : vector<16x32xf32>
    %296 = arith.addf %295, %266 : vector<16x32xf32>
    %c1_117 = arith.constant 1 : index
    %c0_118 = arith.constant 0 : index
    %c0_119 = arith.constant 0 : index
    %297 = vector.load %arg15[%c1_117, %c0_118, %c0_119] : memref<2x1x32xf32, #tpu.memory_space<vmem>>, vector<1x1x32xf32>
    %298 = vector.shape_cast %297 : vector<1x1x32xf32> to vector<1x32xf32>
    %c1_120 = arith.constant 1 : index
    %c0_121 = arith.constant 0 : index
    %c0_122 = arith.constant 0 : index
    %299 = vector.load %arg16[%c1_120, %c0_121, %c0_122] : memref<2x1x32xf32, #tpu.memory_space<vmem>>, vector<1x1x32xf32>
    %300 = vector.shape_cast %299 : vector<1x1x32xf32> to vector<1x32xf32>
    %cst_123 = arith.constant dense<0.000000e+00> : vector<16xf32>
    %301 = vector.multi_reduction <add>, %296, %cst_123 [1] : vector<16x32xf32> to vector<16xf32>
    %302 = vector.shape_cast %301 : vector<16xf32> to vector<16x1xf32>
    %cst_124 = arith.constant 3.200000e+01 : f32
    %303 = vector.broadcast %cst_124 : f32 to vector<16x1xf32>
    %304 = arith.divf %302, %303 : vector<16x1xf32>
    %305 = vector.broadcast %304 : vector<16x1xf32> to vector<16x32xf32>
    %306 = arith.subf %296, %305 : vector<16x32xf32>
    %307 = arith.mulf %306, %306 : vector<16x32xf32>
    %cst_125 = arith.constant dense<0.000000e+00> : vector<16xf32>
    %308 = vector.multi_reduction <add>, %307, %cst_125 [1] : vector<16x32xf32> to vector<16xf32>
    %309 = vector.shape_cast %308 : vector<16xf32> to vector<16x1xf32>
    %cst_126 = arith.constant 3.200000e+01 : f32
    %310 = vector.broadcast %cst_126 : f32 to vector<16x1xf32>
    %311 = arith.divf %309, %310 : vector<16x1xf32>
    %cst_127 = arith.constant 9.99999996E-13 : f32
    %312 = vector.broadcast %cst_127 : f32 to vector<16x1xf32>
    %313 = arith.addf %311, %312 : vector<16x1xf32>
    %314 = math.rsqrt %313 : vector<16x1xf32>
    %315 = vector.broadcast %314 : vector<16x1xf32> to vector<16x32xf32>
    %316 = arith.mulf %306, %315 : vector<16x32xf32>
    %317 = vector.broadcast %298 : vector<1x32xf32> to vector<16x32xf32>
    %318 = arith.mulf %316, %317 : vector<16x32xf32>
    %319 = vector.broadcast %300 : vector<1x32xf32> to vector<16x32xf32>
    %320 = arith.addf %318, %319 : vector<16x32xf32>
    %321 = vector.extract_strided_slice %320 {offsets = [0, 0], sizes = [1, 32], strides = [1, 1]} : vector<16x32xf32> to vector<1x32xf32>
    %322 = vector.extract_strided_slice %320 {offsets = [8, 0], sizes = [1, 32], strides = [1, 1]} : vector<16x32xf32> to vector<1x32xf32>
    %323 = tpu.concatenate %321, %322 in 0 : vector<1x32xf32>, vector<1x32xf32> -> vector<2x32xf32>
    %324 = arith.truncf %323 : vector<2x32xf32> to vector<2x32xbf16>
    %c0_128 = arith.constant 0 : index
    %c0_129 = arith.constant 0 : index
    %325 = vector.load %arg17[%c0_128, %c0_129] : memref<32x32xbf16, #tpu.memory_space<vmem>>, vector<32x32xbf16>
    %cst_130 = arith.constant dense<0.000000e+00> : vector<2x32xf32>
    %326 = tpu.matmul %324, %325, %cst_130 {dimension_numbers = #tpu.dot_dimension_numbers<[1], [0], [0], [1], [0, 0, 1, 1], [], []>} : vector<2x32xbf16>, vector<32x32xbf16>, vector<2x32xf32> -> vector<2x32xf32>
    %c0_131 = arith.constant 0 : index
    %c0_132 = arith.constant 0 : index
    %327 = vector.load %arg18[%c0_131, %c0_132] : memref<1x32xf32, #tpu.memory_space<vmem>>, vector<1x32xf32>
    %328 = vector.broadcast %327 : vector<1x32xf32> to vector<2x32xf32>
    %329 = arith.addf %326, %328 : vector<2x32xf32>
    %cst_133 = arith.constant 0.000000e+00 : f32
    %330 = vector.broadcast %cst_133 : f32 to vector<2x32xf32>
    %331 = arith.maximumf %329, %330 : vector<2x32xf32>
    %332 = arith.truncf %331 : vector<2x32xf32> to vector<2x32xbf16>
    %c0_134 = arith.constant 0 : index
    %c0_135 = arith.constant 0 : index
    %333 = vector.load %arg19[%c0_134, %c0_135] : memref<32x128xbf16, #tpu.memory_space<vmem>>, vector<32x128xbf16>
    %cst_136 = arith.constant dense<0.000000e+00> : vector<2x128xf32>
    %334 = tpu.matmul %332, %333, %cst_136 {dimension_numbers = #tpu.dot_dimension_numbers<[1], [0], [0], [1], [0, 0, 1, 1], [], []>} : vector<2x32xbf16>, vector<32x128xbf16>, vector<2x128xf32> -> vector<2x128xf32>
    %c0_137 = arith.constant 0 : index
    %c0_138 = arith.constant 0 : index
    %335 = vector.load %arg20[%c0_137, %c0_138] : memref<1x128xf32, #tpu.memory_space<vmem>>, vector<1x128xf32>
    %336 = vector.broadcast %335 : vector<1x128xf32> to vector<2x128xf32>
    %337 = arith.addf %334, %336 : vector<2x128xf32>
    %338 = vector.shape_cast %337 : vector<2x128xf32> to vector<1x2x128xf32>
    %c0_139 = arith.constant 0 : index
    %c0_140 = arith.constant 0 : index
    %c0_141 = arith.constant 0 : index
    %339 = vector.load %arg21[%c0_139, %c0_140, %c0_141] : memref<1x2x128xf32, #tpu.memory_space<vmem>>, vector<1x2x128xf32>
    tpu.vector_store %arg21[%c0_139, %c0_140, %c0_141], %338 {strides = array<i32>} : memref<1x2x128xf32, #tpu.memory_space<vmem>>, vector<1x2x128xf32>,
    return
  }
  func.func @transform_0(%arg0: i32) -> (i32, i32, i32) {
    %c0_i32 = arith.constant 0 : i32
    %c0_i32_0 = arith.constant 0 : i32
    %c0_i32_1 = arith.constant 0 : i32
    return %arg0, %c0_i32, %c0_i32_0 : i32, i32, i32
  }
  func.func @transform_1(%arg0: i32) -> (i32, i32, i32) {
    %c0_i32 = arith.constant 0 : i32
    %c0_i32_0 = arith.constant 0 : i32
    %c0_i32_1 = arith.constant 0 : i32
    return %arg0, %c0_i32, %c0_i32_0 : i32, i32, i32
  }
  func.func @transform_2(%arg0: i32) -> (i32, i32) {
    %c0_i32 = arith.constant 0 : i32
    %c0_i32_0 = arith.constant 0 : i32
    %c0_i32_1 = arith.constant 0 : i32
    return %c0_i32, %c0_i32_0 : i32, i32
  }
  func.func @transform_3(%arg0: i32) -> (i32, i32) {
    %c0_i32 = arith.constant 0 : i32
    %c0_i32_0 = arith.constant 0 : i32
    %c0_i32_1 = arith.constant 0 : i32
    return %c0_i32, %c0_i32_0 : i32, i32
  }
  func.func @transform_4(%arg0: i32) -> (i32, i32, i32) {
    %c0_i32 = arith.constant 0 : i32
    %c0_i32_0 = arith.constant 0 : i32
    %c0_i32_1 = arith.constant 0 : i32
    %c0_i32_2 = arith.constant 0 : i32
    return %c0_i32, %c0_i32_0, %c0_i32_1 : i32, i32, i32
  }
  func.func @transform_5(%arg0: i32) -> (i32, i32, i32) {
    %c0_i32 = arith.constant 0 : i32
    %c0_i32_0 = arith.constant 0 : i32
    %c0_i32_1 = arith.constant 0 : i32
    %c0_i32_2 = arith.constant 0 : i32
    return %c0_i32, %c0_i32_0, %c0_i32_1 : i32, i32, i32
  }
  func.func @transform_6(%arg0: i32) -> (i32, i32, i32) {
    %c0_i32 = arith.constant 0 : i32
    %c0_i32_0 = arith.constant 0 : i32
    %c0_i32_1 = arith.constant 0 : i32
    %c0_i32_2 = arith.constant 0 : i32
    return %c0_i32, %c0_i32_0, %c0_i32_1 : i32, i32, i32
  }
  func.func @transform_7(%arg0: i32) -> (i32, i32, i32) {
    %c0_i32 = arith.constant 0 : i32
    %c0_i32_0 = arith.constant 0 : i32
    %c0_i32_1 = arith.constant 0 : i32
    %c0_i32_2 = arith.constant 0 : i32
    return %c0_i32, %c0_i32_0, %c0_i32_1 : i32, i32, i32
  }
  func.func @transform_8(%arg0: i32) -> (i32, i32, i32) {
    %c0_i32 = arith.constant 0 : i32
    %c0_i32_0 = arith.constant 0 : i32
    %c0_i32_1 = arith.constant 0 : i32
    %c0_i32_2 = arith.constant 0 : i32
    return %c0_i32, %c0_i32_0, %c0_i32_1 : i32, i32, i32
  }
  func.func @transform_9(%arg0: i32) -> (i32, i32, i32) {
    %c0_i32 = arith.constant 0 : i32
    %c0_i32_0 = arith.constant 0 : i32
    %c0_i32_1 = arith.constant 0 : i32
    %c0_i32_2 = arith.constant 0 : i32
    return %c0_i32, %c0_i32_0, %c0_i32_1 : i32, i32, i32
  }
  func.func @transform_10(%arg0: i32) -> (i32, i32, i32) {
    %c0_i32 = arith.constant 0 : i32
    %c0_i32_0 = arith.constant 0 : i32
    %c0_i32_1 = arith.constant 0 : i32
    %c0_i32_2 = arith.constant 0 : i32
    return %c0_i32, %c0_i32_0, %c0_i32_1 : i32, i32, i32
  }
  func.func @transform_11(%arg0: i32) -> (i32, i32, i32) {
    %c0_i32 = arith.constant 0 : i32
    %c0_i32_0 = arith.constant 0 : i32
    %c0_i32_1 = arith.constant 0 : i32
    %c0_i32_2 = arith.constant 0 : i32
    return %c0_i32, %c0_i32_0, %c0_i32_1 : i32, i32, i32
  }
  func.func @transform_12(%arg0: i32) -> (i32, i32, i32) {
    %c0_i32 = arith.constant 0 : i32
    %c0_i32_0 = arith.constant 0 : i32
    %c0_i32_1 = arith.constant 0 : i32
    %c0_i32_2 = arith.constant 0 : i32
    return %c0_i32, %c0_i32_0, %c0_i32_1 : i32, i32, i32
  }
  func.func @transform_13(%arg0: i32) -> (i32, i32, i32) {
    %c0_i32 = arith.constant 0 : i32
    %c0_i32_0 = arith.constant 0 : i32
    %c0_i32_1 = arith.constant 0 : i32
    %c0_i32_2 = arith.constant 0 : i32
    return %c0_i32, %c0_i32_0, %c0_i32_1 : i32, i32, i32
  }
  func.func @transform_14(%arg0: i32) -> (i32, i32, i32) {
    %c0_i32 = arith.constant 0 : i32
    %c0_i32_0 = arith.constant 0 : i32
    %c0_i32_1 = arith.constant 0 : i32
    %c0_i32_2 = arith.constant 0 : i32
    return %c0_i32, %c0_i32_0, %c0_i32_1 : i32, i32, i32
  }
  func.func @transform_15(%arg0: i32) -> (i32, i32, i32) {
    %c0_i32 = arith.constant 0 : i32
    %c0_i32_0 = arith.constant 0 : i32
    %c0_i32_1 = arith.constant 0 : i32
    %c0_i32_2 = arith.constant 0 : i32
    return %c0_i32, %c0_i32_0, %c0_i32_1 : i32, i32, i32
  }
  func.func @transform_16(%arg0: i32) -> (i32, i32) {
    %c0_i32 = arith.constant 0 : i32
    %c0_i32_0 = arith.constant 0 : i32
    %c0_i32_1 = arith.constant 0 : i32
    return %c0_i32, %c0_i32_0 : i32, i32
  }
  func.func @transform_17(%arg0: i32) -> (i32, i32) {
    %c0_i32 = arith.constant 0 : i32
    %c0_i32_0 = arith.constant 0 : i32
    %c0_i32_1 = arith.constant 0 : i32
    return %c0_i32, %c0_i32_0 : i32, i32
  }
  func.func @transform_18(%arg0: i32) -> (i32, i32) {
    %c0_i32 = arith.constant 0 : i32
    %c0_i32_0 = arith.constant 0 : i32
    %c0_i32_1 = arith.constant 0 : i32
    return %c0_i32, %c0_i32_0 : i32, i32
  }
  func.func @transform_19(%arg0: i32) -> (i32, i32) {
    %c0_i32 = arith.constant 0 : i32
    %c0_i32_0 = arith.constant 0 : i32
    %c0_i32_1 = arith.constant 0 : i32
    return %c0_i32, %c0_i32_0 : i32, i32
  }
  func.func @transform_20(%arg0: i32) -> (i32, i32, i32) {
    %c0_i32 = arith.constant 0 : i32
    %c0_i32_0 = arith.constant 0 : i32
    %c0_i32_1 = arith.constant 0 : i32
    return %arg0, %c0_i32, %c0_i32_0 : i32, i32, i32
  }
}

</mosaic_0001>

<bundles_post_ra>
// kernel: bert_text_classifier.1
= control target key start
LH: loop header
LB: loop body
LE: loop exit
PB: predicated region body
PF: predicated region fallthrough
CT: control target
= control target key end

     0   :  { %s3153_s0 = inlined_call_operand.vmem [shape: f32[1,16,16], index: 0, kind: input, shape index: {}]   ;;  %s3154_s1 = inlined_call_operand.vmem [shape: f32[1,16,32], index: 1, kind: input, shape index: {}]   ;;  %s3155_s2 = inlined_call_operand.vmem [shape: f32[1,32], index: 2, kind: input, shape index: {}]   ;;  %s3156_s3 = inlined_call_operand.vmem [shape: f32[1,32], index: 3, kind: input, shape index: {}]   ;;  %s3157_s4 = inlined_call_operand.vmem [shape: bf16[2,32,96], index: 4, kind: input, shape index: {}]   ;;  %s3158_s5 = inlined_call_operand.vmem [shape: f32[2,1,96], index: 5, kind: input, shape index: {}]   ;;  %s3159_s6 = inlined_call_operand.vmem [shape: bf16[2,32,32], index: 6, kind: input, shape index: {}]   ;;  %s3160_s7 = inlined_call_operand.vmem [shape: f32[2,1,32], index: 7, kind: input, shape index: {}]   ;;  %s3161_s8 = inlined_call_operand.vmem [shape: f32[2,1,32], index: 8, kind: input, shape index: {}]   ;;  %s3162_s9 = inlined_call_operand.vmem [shape: f32[2,1,32], index: 9, kind: input, shape index: {}]   ;;  %s3163_s10 = inlined_call_operand.vmem [shape: bf16[2,32,64], index: 10, kind: input, shape index: {}]   ;;  %s3164_s11 = inlined_call_operand.vmem [shape: f32[2,1,64], index: 11, kind: input, shape index: {}]   ;;  %s3165_s12 = inlined_call_operand.vmem [shape: bf16[2,64,32], index: 12, kind: input, shape index: {}]   ;;  %s3166_s13 = inlined_call_operand.vmem [shape: f32[2,1,32], index: 13, kind: input, shape index: {}]   ;;  %s3167_s14 = inlined_call_operand.vmem [shape: f32[2,1,32], index: 14, kind: input, shape index: {}]   ;;  %s3168_s15 = inlined_call_operand.vmem [shape: f32[2,1,32], index: 15, kind: input, shape index: {}]   ;;  %s3169_s16 = inlined_call_operand.vmem [shape: bf16[32,32], index: 16, kind: input, shape index: {}]   ;;  %s3170_s17 = inlined_call_operand.vmem [shape: f32[1,32], index: 17, kind: input, shape index: {}]   ;;  %s3171_s18 = inlined_call_operand.vmem [shape: bf16[32,128], index: 18, kind: input, shape index: {}]   ;;  %s3172_s19 = inlined_call_operand.vmem [shape: f32[1,128], index: 19, kind: input, shape index: {}]   ;;  %s3173_s20 = inlined_call_operand.hbm [shape: f32[1,2,128], index: 20, kind: output, shape index: {}]  }
   0x1   :  { %3178 = sst [smem:[#allocation5_spill]] %s3153_s0 }
   0x2   :  { %3179 = sst [smem:[#allocation6_spill]] %s3154_s1 }
   0x3   :  { %3180 = sst [smem:[#allocation7_spill]] %s3155_s2 }
   0x4   :  { %3181 = sst [smem:[#allocation8_spill]] %s3156_s3 }
   0x5   :  { %3182 = sst [smem:[#allocation9_spill]] %s3157_s4 }
   0x6   :  { %s3183_s23 = sld [smem:[#allocation6_spill]]  ;;  %vm73_vm0 = vcmask 261120  }
   0xc   :  { %v69_v0 = vld [vmem:[%s3183_s23] sm:$0xff]  ;;  %v70_v1 = vld [vmem:[%s3183_s23 + $0x8] sm:$0xff] }
   0xd   :  { %v74_v2 = vsel %vm73_vm0, %v69_v0, 0.0  ;;  %v77_v3 = vsel %vm73_vm0, %v70_v1, 0.0 }
   0xe   :  { %75 = vadd.xlane.f32.xlu0 %v74_v2 }
  0x12   :  { %78 = vadd.xlane.f32.xlu0 %v77_v3 }
  0x13   :  { %25 = vsyncpa [#allocation3], 0  ;;  %s3184_s26 = sld [smem:[#allocation9_spill]]  ;;  %v2587_v15 = vmov 0.0   ;;  %vm2588_vm1 = vmmov 0   ;;  %s3185_s30 = sld [smem:[#allocation7_spill]] }
  0x14   :  { %2252 = vmatprep.subr.bf16.mxu0 %v2587_v15  ;;  %2260 = vmatprep.subr.bf16.mxu1 %v2587_v15  ;;  %s3186_s1 = sld [smem:[#allocation8_spill]]  ;;  %v2090_v34 = vld [vmem:[%s3158_s5] ss:$0 sm:$0xff]  ;;  %s2589_s24 = smov 112   ;;  %vm195_vm2 = vcmask 64512   ;;  %vm390_vm3 = vcmask 130048  }
  0x15   :  { %2256 = vmatprep.mubr.msk.bf16.mxu0 %vm2588_vm1, %v2587_v15  ;;  %2262 = vmatprep.mubr.msk.bf16.mxu1 %vm2588_vm1, %v2587_v15  ;;  %s2590_s2 = smov 120   ;;  %s2591_s25 = smov 104   ;;  %vm689_vm4 = vcmask 195584   ;;  %vm930_vm5 = vcmask 523264   ;;  %vm1936_vm6 = vcmask 1040384  }
  0x16   :  { %s2592_s3 = smov 96   ;;  %s3187_s4 = sld [smem:[#allocation5_spill]] }
  0x17   :  { %s2593_s0 = smov 64   ;;  %s2594_s27 = smov 8  }
  0x18   :  { %s2595_s28 = smov 16  }
  0x19   :  { %v2447_v14 = vld [vmem:[%s3184_s26] sm:$0xff]   ;;  %v2448_v16 = vld [vmem:[%s3184_s26 + $0x8] sm:$0xff]  }
  0x1a   :  { %2253 = vmatpush3.bf16.msra.mxu0 %v2447_v14  ;;  %v2088_v25 = vld [vmem:[%s3185_s30] ss:$0 sm:$0xff]  ;;  %s2597_s30 = smov [#allocation2]  }
  0x1b   :  { %2254 = vmatprep.subr.bf16.mxu0 %v2587_v15  ;;  %v2089_v29 = vld [vmem:[%s3186_s1] ss:$0 sm:$0xff] }
  0x1c   :  { %v2794_v53 = vld [vmem:[%s3187_s4] sm:$0xff]  ;;  %v2799_v55 = vld [vmem:[%s3187_s4 + $0x8] sm:$0xff]  ;;  %s3177_s4 = smov 24  }
  0x1e   :  { %2255 = vmatpush3.bf16.msra.mxu0 %v2448_v16 }
  0x1f   :  { %2266 = vmatprep.subr.bf16.mxu0 %v2587_v15 }
  0x9b   :  { %v76_v4 = vpop.xlane.xlu0 %75 }
  0x9c   :  { %v81_v5 = vmul.f32 0.03125, %v76_v4 }
  0x9e   :  { %v83_v6 = vsub.f32 %v69_v0, %v81_v5 }
  0x9f   :  { %v79_v7 = vpop.xlane.xlu0 %78 }
  0xa0   :  { %v82_v8 = vmul.f32 0.03125, %v79_v7  ;;  %v85_v9 = vmul.f32 %v83_v6, %v83_v6 }
  0xa2   :  { %v84_v10 = vsub.f32 %v70_v1, %v82_v8  ;;  %v87_v11 = vsel %vm73_vm0, %v85_v9, 0.0 }
  0xa3   :  { %88 = vadd.xlane.f32.xlu1 %v87_v11 }
  0xa4   :  { %v86_v12 = vmul.f32 %v84_v10, %v84_v10 }
  0xa6   :  { %v90_v13 = vsel %vm73_vm0, %v86_v12, 0.0 }
  0xa7   :  { %91 = vadd.xlane.f32.xlu1 %v90_v13 }
 0x130   :  { %v89_v17 = vpop.xlane.xlu1 %88 }
 0x131   :  { %v93_v18 = vmul.f32 0.03125, %v89_v17 }
 0x133   :  { %v95_v19 = vadd.f32 1e-12, %v93_v18 }
 0x134   :  { %v92_v20 = vpop.xlane.xlu1 %91 }
 0x135   :  { %2471 = vrsqrt.f32 %v95_v19  ;;  %v94_v21 = vmul.f32 0.03125, %v92_v20 }
 0x137   :  { %v96_v22 = vadd.f32 1e-12, %v94_v21 }
 0x139   :  { %2473 = vrsqrt.f32 %v96_v22 }
 0x13f   :  { %v2472_v23 = vpop.eup %2471 }
 0x140   :  { %v99_v24 = vmul.f32 %v2472_v23, %v83_v6 }
 0x142   :  { %v107_v28 = vmul.f32 %v2088_v25, %v99_v24 }
 0x143   :  { %v2474_v26 = vpop.eup %2473 }
 0x144   :  { %v100_v27 = vmul.f32 %v2474_v26, %v84_v10  ;;  %v2733_v31 = vadd.f32 %v2089_v29, %v107_v28 }
 0x146   :  { %v108_v30 = vmul.f32 %v2088_v25, %v100_v27 }
 0x148   :  { %v2735_v32 = vadd.f32 %v2089_v29, %v108_v30 }
 0x14a   :  { %v117_v33 = vpack.c.bf16 %v2735_v32, %v2733_v31 }
 0x14c   :  { %2257 = vmatmul.mubr.msk.bf16.vlgmr.msra.gmra.mrb[0].mxu0 %vm73_vm0, %v117_v33 }
 0x14d   :  { %2268 = vmatprep.mubr.msk.bf16.mxu0 %vm2588_vm1, %v2587_v15 }
 0x21f   :  { %v178_v35 = vpop.f32.mrb[0].mxu0 }
 0x220   :  { %v2258_v36 = vpop.f32.mrb[1].mxu0  ;;  %v179_v38 = vadd.f32 %v2090_v34, %v178_v35 }
 0x221   :  { %v181_v37 = vpop.f32.mrb[2].mxu0 }
 0x222   :  { %v182_v39 = vadd.f32 %v2090_v34, %v181_v37  ;;  %v2259_v40 = vpop.f32.mrb[3].mxu0 }
 0x224   :  { %v2745_v41 = vpack.c.bf16 %v182_v39, %v179_v38 }
 0x226   :  { %189 = vrot.lane.b32.xlu1 %v2745_v41, %s2589_s24  ;;  %187 = vrot.lane.b32.xlu0 %v2745_v41, %s2590_s2 }
 0x22a   :  { %191 = vrot.lane.b32.xlu1 %v2745_v41, %s2591_s25 }
 0x22e   :  { %193 = vrot.lane.b32.xlu1 %v2745_v41, %s2592_s3 }
 0x298   :  { %v2755_v42 = vpop.permute.xlu1 %189  ;;  %v2757_v43 = vpop.permute.xlu0 %187 }
 0x299   :  { %292 = vrot.lane.b32.xlu1 %v2755_v42, %s2592_s3  ;;  %243 = vrot.lane.b32.xlu0 %v2757_v43, %s2592_s3 }
 0x29c   :  { %v2763_v44 = vpop.permute.xlu1 %191 }
 0x29d   :  { %341 = vrot.lane.b32.xlu0 %v2763_v44, %s2592_s3 }
 0x2a0   :  { %v194_v45 = vpop.permute.xlu1 %193 }
 0x2a1   :  { %v200_v46 = vsel %vm195_vm2, %v194_v45, 0 }
 0x2a2   :  { %2261 = vmatpush3.bf16.xpose.msra.mxu1 %v200_v46 }
 0x2a3   :  { %2272 = vmatprep.subr.bf16.mxu1 %v2587_v15 }
 0x2a9   :  { %2263 = vmatmul.mubr.msk.bf16.vlgmr.msra.gmra.mrb[0].mxu1 %vm195_vm2, %v2745_v41 }
 0x2aa   :  { %2274 = vmatprep.mubr.msk.bf16.mxu1 %vm2588_vm1, %v2587_v15 }
 0x30b   :  { %v293_v47 = vpop.permute.xlu1 %292  ;;  %v244_v48 = vpop.permute.xlu0 %243 }
 0x30c   :  { %v298_v49 = vsel %vm195_vm2, %v293_v47, 0  ;;  %v249_v50 = vsel %vm195_vm2, %v244_v48, 0 }
 0x30d   :  { %2267 = vmatpush3.bf16.xpose.msra.mxu0 %v249_v50  ;;  %2273 = vmatpush3.bf16.xpose.msra.mxu1 %v298_v49 }
 0x30e   :  { %2278 = vmatprep.subr.bf16.mxu0 %v2587_v15  ;;  %2284 = vmatprep.subr.bf16.mxu1 %v2587_v15 }
 0x30f   :  { %v342_v51 = vpop.permute.xlu0 %341 }
 0x310   :  { %v347_v52 = vsel %vm195_vm2, %v342_v51, 0 }
 0x314   :  { %2269 = vmatmul.mubr.msk.bf16.vlgmr.msra.gmra.mrb[4].mxu0 %vm195_vm2, %v2757_v43  ;;  %2275 = vmatmul.mubr.msk.bf16.vlgmr.msra.gmra.mrb[4].mxu1 %vm195_vm2, %v2755_v42 }
 0x315   :  { %2279 = vmatpush3.bf16.xpose.msra.mxu0 %v347_v52  ;;  %2280 = vmatprep.mubr.msk.bf16.mxu0 %vm2588_vm1, %v2587_v15 }
 0x316   :  { %2286 = vmatprep.mubr.msk.bf16.mxu1 %vm2588_vm1, %v2587_v15  ;;  %2290 = vmatprep.subr.bf16.mxu0 %v2587_v15 }
 0x31c   :  { %2281 = vmatmul.mubr.msk.bf16.vlgmr.msra.gmra.mrb[8].mxu0 %vm195_vm2, %v2763_v44 }
 0x31d   :  { %2292 = vmatprep.mubr.msk.bf16.mxu0 %vm2588_vm1, %v2587_v15 }
 0x37c   :  { %v236_v54 = vpop.f32.mrb[0].mxu1 }
 0x37d   :  { %v237_v56 = vadd.f32 %v236_v54, %v2794_v53  ;;  %v2264_v57 = vpop.f32.mrb[1].mxu1 }
 0x37e   :  { %v239_v58 = vpop.f32.mrb[2].mxu1 }
 0x37f   :  { %v240_v59 = vadd.f32 %v239_v58, %v2799_v55  ;;  %v2265_v60 = vpop.f32.mrb[3].mxu1  ;;  %v391_v61 = vsel %vm390_vm3, %v237_v56, -inf }
 0x380   :  { %392 = vmax.xlane.f32.xlu1 %v391_v61 }
 0x381   :  { %v394_v62 = vsel %vm390_vm3, %v240_v59, -inf }
 0x382   :  { %395 = vmax.xlane.f32.xlu0 %v394_v62 }
 0x3e7   :  { %v285_v63 = vpop.f32.mrb[4].mxu0  ;;  %v334_v0 = vpop.f32.mrb[4].mxu1 }
 0x3e8   :  { %v286_v1 = vadd.f32 %v285_v63, %v2794_v53  ;;  %v335_v2 = vadd.f32 %v334_v0, %v2794_v53  ;;  %v2270_v3 = vpop.f32.mrb[5].mxu0  ;;  %v2276_v4 = vpop.f32.mrb[5].mxu1 }
 0x3e9   :  { %v288_v5 = vpop.f32.mrb[6].mxu0  ;;  %v337_v6 = vpop.f32.mrb[6].mxu1 }
 0x3ea   :  { %v289_v7 = vadd.f32 %v288_v5, %v2799_v55  ;;  %v2271_v8 = vpop.f32.mrb[7].mxu0  ;;  %v2277_v9 = vpop.f32.mrb[7].mxu1  ;;  %v397_v10 = vsel %vm390_vm3, %v286_v1, -inf  ;;  %v403_v11 = vsel %vm390_vm3, %v335_v2, -inf  ;;  %v338_v12 = vadd.f32 %v337_v6, %v2799_v55 }
 0x3eb   :  { %398 = vmax.xlane.f32.xlu0 %v397_v10  ;;  %404 = vmax.xlane.f32.xlu1 %v403_v11 }
 0x3ec   :  { %v400_v13 = vsel %vm390_vm3, %v289_v7, -inf  ;;  %v406_v21 = vsel %vm390_vm3, %v338_v12, -inf }
 0x3ef   :  { %v383_v14 = vpop.f32.mrb[8].mxu0  ;;  %401 = vmax.xlane.f32.xlu0 %v400_v13 }
 0x3f0   :  { %v384_v16 = vadd.f32 %v383_v14, %v2794_v53  ;;  %v2282_v17 = vpop.f32.mrb[9].mxu0 }
 0x3f1   :  { %v386_v18 = vpop.f32.mrb[10].mxu0 }
 0x3f2   :  { %v387_v19 = vadd.f32 %v386_v18, %v2799_v55  ;;  %v2283_v20 = vpop.f32.mrb[11].mxu0  ;;  %v409_v22 = vsel %vm390_vm3, %v384_v16, -inf }
 0x3f3   :  { %407 = vmax.xlane.f32.xlu0 %v406_v21  ;;  %410 = vmax.xlane.f32.xlu1 %v409_v22 }
 0x3f4   :  { %v412_v23 = vsel %vm390_vm3, %v387_v19, -inf }
 0x3f7   :  { %413 = vmax.xlane.f32.xlu0 %v412_v23 }
 0x404   :  { %483 = vrot.lane.b32.xlu1 %v2745_v41, %s2593_s0 }
 0x40d   :  { %v393_v24 = vpop.xlane.xlu1 %392 }
 0x40e   :  { %v415_v27 = vsub.f32 %v237_v56, %v393_v24 }
 0x40f   :  { %v396_v25 = vpop.xlane.xlu0 %395 }
 0x410   :  { %v416_v26 = vsub.f32 %v240_v59, %v396_v25  ;;  %v423_v29 = vmul.f32 1.442695, %v415_v27 }
 0x412   :  { %v425_v28 = vmul.f32 1.442695, %v416_v26 }
 0x414   :  { %2475 = vpow2.f32 %v425_v28 }
 0x415   :  { %2477 = vpow2.f32 %v423_v29 }
 0x41e   :  { %v2476_v30 = vpop.eup %2475 }
 0x41f   :  { %v442_v33 = vsel %vm390_vm3, %v2476_v30, 0.0  ;;  %v2478_v34 = vpop.eup %2477 }
 0x420   :  { %443 = vadd.xlane.f32.xlu0 %v442_v33  ;;  %v439_v35 = vsel %vm390_vm3, %v2478_v34, 0.0 }
 0x428   :  { %440 = vadd.xlane.f32.xlu1 %v439_v35 }
 0x478   :  { %v399_v36 = vpop.xlane.xlu0 %398  ;;  %v405_v37 = vpop.xlane.xlu1 %404 }
 0x479   :  { %v417_v38 = vsub.f32 %v286_v1, %v399_v36  ;;  %v419_v39 = vsub.f32 %v335_v2, %v405_v37 }
 0x47b   :  { %v427_v40 = vmul.f32 1.442695, %v417_v38  ;;  %v431_v41 = vmul.f32 1.442695, %v419_v39 }
 0x47c   :  { %v402_v45 = vpop.xlane.xlu0 %401 }
 0x47d   :  { %2479 = vpow2.f32 %v427_v40  ;;  %v418_v46 = vsub.f32 %v289_v7, %v402_v45 }
 0x47e   :  { %2481 = vpow2.f32 %v431_v41 }
 0x47f   :  { %v429_v47 = vmul.f32 1.442695, %v418_v46 }
 0x480   :  { %v408_v48 = vpop.xlane.xlu0 %407  ;;  %v411_v49 = vpop.xlane.xlu1 %410 }
 0x481   :  { %2483 = vpow2.f32 %v429_v47  ;;  %v420_v50 = vsub.f32 %v338_v12, %v408_v48  ;;  %v421_v51 = vsub.f32 %v384_v16, %v411_v49  ;;  %v2449_v47 = vld [vmem:[%s3159_s6] sm:$0xff]   ;;  %v2450_v48 = vld [vmem:[%s3159_s6 + $0x8] sm:$0xff]  }
 0x483   :  { %v433_v52 = vmul.f32 1.442695, %v420_v50  ;;  %v435_v54 = vmul.f32 1.442695, %v421_v51 }
 0x484   :  { %v414_v56 = vpop.xlane.xlu0 %413  ;;  %v484_v57 = vpop.permute.xlu1 %483 }
 0x485   :  { %2485 = vpow2.f32 %v433_v52  ;;  %v422_v58 = vsub.f32 %v387_v19, %v414_v56  ;;  %2285 = vmatpush3.bf16.msra.mxu1 %v484_v57 }
 0x486   :  { %2487 = vpow2.f32 %v435_v54  ;;  %2296 = vmatprep.subr.bf16.mxu1 %v2587_v15 }
 0x487   :  { %v2480_v59 = vpop.eup %2479  ;;  %v437_v60 = vmul.f32 1.442695, %v422_v58 }
 0x488   :  { %v445_v61 = vsel %vm390_vm3, %v2480_v59, 0.0  ;;  %v2482_v62 = vpop.eup %2481 }
 0x489   :  { %2489 = vpow2.f32 %v437_v60  ;;  %446 = vadd.xlane.f32.xlu1 %v445_v61  ;;  %v451_v1 = vsel %vm390_vm3, %v2482_v62, 0.0 }
 0x48b   :  { %v2484_v63 = vpop.eup %2483 }
 0x48c   :  { %v448_v0 = vsel %vm390_vm3, %v2484_v63, 0.0 }
 0x48d   :  { %449 = vadd.xlane.f32.xlu0 %v448_v0  ;;  %452 = vadd.xlane.f32.xlu1 %v451_v1 }
 0x48f   :  { %v2486_v2 = vpop.eup %2485 }
 0x490   :  { %v2488_v3 = vpop.eup %2487  ;;  %v454_v4 = vsel %vm390_vm3, %v2486_v2, 0.0 }
 0x491   :  { %455 = vadd.xlane.f32.xlu0 %v454_v4  ;;  %v457_v5 = vsel %vm390_vm3, %v2488_v3, 0.0 }
 0x492   :  { %458 = vadd.xlane.f32.xlu1 %v457_v5 }
 0x493   :  { %v2490_v6 = vpop.eup %2489 }
 0x494   :  { %v460_v7 = vsel %vm390_vm3, %v2490_v6, 0.0 }
 0x495   :  { %461 = vadd.xlane.f32.xlu0 %v460_v7 }
 0x4a3   :  { %577 = vrot.lane.b32.xlu1 %v2755_v42, %s2593_s0 }
 0x4a7   :  { %624 = vrot.lane.b32.xlu1 %v2763_v44, %s2593_s0 }
 0x4ab   :  { %530 = vrot.lane.b32.xlu0 %v2757_v43, %s2593_s0 }
 0x4ad   :  { %v444_v8 = vpop.xlane.xlu0 %443 }
 0x4ae   :  { %2491 = vrcp.f32 %v444_v8  ;;  %v2102_v8 = vld [vmem:[%s3160_s7] ss:$0 sm:$0xff] }
 0x4b5   :  { %v441_v9 = vpop.xlane.xlu1 %440 }
 0x4b6   :  { %2493 = vrcp.f32 %v441_v9 }
 0x4b8   :  { %v2492_v10 = vpop.eup %2491 }
 0x4b9   :  { %v472_v12 = vmul.f32 %v2492_v10, %v2476_v30 }
 0x4c0   :  { %v2494_v11 = vpop.eup %2493 }
 0x4c1   :  { %v471_v13 = vmul.f32 %v2494_v11, %v2478_v34 }
 0x4c3   :  { %v479_v14 = vpack.c.bf16 %v472_v12, %v471_v13 }
 0x4c5   :  { %2287 = vmatmul.mubr.msk.bf16.vlgmr.msra.gmra.mrb[8].mxu1 %vm390_vm3, %v479_v14 }
 0x4c6   :  { %2298 = vmatprep.mubr.msk.bf16.mxu1 %vm2588_vm1, %v2587_v15 }
 0x516   :  { %v447_v42 = vpop.xlane.xlu1 %446 }
 0x517   :  { %2495 = vrcp.f32 %v447_v42 }
 0x51a   :  { %v450_v44 = vpop.xlane.xlu0 %449  ;;  %v453_v16 = vpop.xlane.xlu1 %452 }
 0x51b   :  { %2497 = vrcp.f32 %v450_v44 }
 0x51c   :  { %2499 = vrcp.f32 %v453_v16 }
 0x51e   :  { %v456_v43 = vpop.xlane.xlu0 %455 }
 0x51f   :  { %2501 = vrcp.f32 %v456_v43  ;;  %v459_v17 = vpop.xlane.xlu1 %458 }
 0x520   :  { %2503 = vrcp.f32 %v459_v17 }
 0x521   :  { %v2496_v19 = vpop.eup %2495 }
 0x522   :  { %v462_v18 = vpop.xlane.xlu0 %461  ;;  %v473_v22 = vmul.f32 %v2496_v19, %v2480_v59 }
 0x523   :  { %2505 = vrcp.f32 %v462_v18  ;;  %v578_v20 = vpop.permute.xlu1 %577 }
 0x524   :  { %2297 = vmatpush3.bf16.msra.mxu1 %v578_v20 }
 0x525   :  { %v2498_v21 = vpop.eup %2497  ;;  %2308 = vmatprep.subr.bf16.mxu1 %v2587_v15 }
 0x526   :  { %v474_v23 = vmul.f32 %v2498_v21, %v2484_v63  ;;  %v531_v24 = vpop.permute.xlu0 %530  ;;  %v2500_v25 = vpop.eup %2499 }
 0x527   :  { %2291 = vmatpush3.bf16.msra.mxu0 %v531_v24  ;;  %v475_v28 = vmul.f32 %v2500_v25, %v2482_v62  ;;  %v625_v30 = vpop.permute.xlu1 %624 }
 0x528   :  { %v480_v26 = vpack.c.bf16 %v474_v23, %v473_v22  ;;  %2302 = vmatprep.subr.bf16.mxu0 %v2587_v15 }
 0x529   :  { %v2502_v27 = vpop.eup %2501 }
 0x52a   :  { %v476_v29 = vmul.f32 %v2502_v27, %v2486_v2  ;;  %2293 = vmatmul.mubr.msk.bf16.vlgmr.msra.gmra.mrb[12].mxu0 %vm390_vm3, %v480_v26  ;;  %v2504_v33 = vpop.eup %2503  ;;  %v2452_v26 = vld [vmem:[%s3163_s10 + $0x8] sm:$0xff]  }
 0x52b   :  { %2303 = vmatpush3.bf16.msra.mxu0 %v625_v30  ;;  %2304 = vmatprep.mubr.msk.bf16.mxu0 %vm2588_vm1, %v2587_v15  ;;  %v477_v36 = vmul.f32 %v2504_v33, %v2488_v3 }
 0x52c   :  { %v481_v34 = vpack.c.bf16 %v476_v29, %v475_v28  ;;  %2316 = vmatprep.subr.bf16.mxu0 %v2587_v15 }
 0x52d   :  { %v2506_v35 = vpop.eup %2505 }
 0x52e   :  { %v478_v37 = vmul.f32 %v2506_v35, %v2490_v6  ;;  %2299 = vmatmul.mubr.msk.bf16.vlgmr.msra.gmra.mrb[12].mxu1 %vm390_vm3, %v481_v34 }
 0x52f   :  { %2312 = vmatprep.mubr.msk.bf16.mxu1 %vm2588_vm1, %v2587_v15  ;;  %2309 = vmatpush3.bf16.msra.mxu1 %v2449_v47 }
 0x530   :  { %v482_v38 = vpack.c.bf16 %v478_v37, %v477_v36  ;;  %2310 = vmatprep.subr.bf16.mxu1 %v2587_v15  ;;  %v2106_v37 = vld [vmem:[%s3161_s8] ss:$0 sm:$0xff] }
 0x532   :  { %2305 = vmatmul.mubr.msk.bf16.vlgmr.msra.gmra.mrb[16].mxu0 %vm390_vm3, %v482_v38 }
 0x533   :  { %2320 = vmatprep.mubr.msk.bf16.mxu0 %vm2588_vm1, %v2587_v15  ;;  %2311 = vmatpush3.bf16.msra.mxu1 %v2450_v48 }
 0x534   :  { %2324 = vmatprep.subr.bf16.mxu1 %v2587_v15 }
 0x598   :  { %v523_v39 = vpop.f32.mrb[8].mxu1 }
 0x599   :  { %v2288_v40 = vpop.f32.mrb[9].mxu1 }
 0x59a   :  { %v526_v41 = vpop.f32.mrb[10].mxu1 }
 0x59b   :  { %v671_v45 = vpack.c.bf16 %v526_v41, %v523_v39  ;;  %v2289_v46 = vpop.f32.mrb[11].mxu1  ;;  %v2107_v41 = vld [vmem:[%s3162_s9] ss:$0 sm:$0xff] }
 0x5fd   :  { %v570_v49 = vpop.f32.mrb[12].mxu0 }
 0x5fe   :  { %v2294_v50 = vpop.f32.mrb[13].mxu0 }
 0x5ff   :  { %v573_v51 = vpop.f32.mrb[14].mxu0  ;;  %v2454_v50 = vld [vmem:[%s3165_s12 + $0x8] sm:$0xff]  }
 0x600   :  { %v672_v52 = vpack.c.bf16 %v573_v51, %v570_v49  ;;  %v2295_v54 = vpop.f32.mrb[15].mxu0  ;;  %v2453_v49 = vld [vmem:[%s3165_s12] sm:$0xff]   ;;  %v2455_v51 = vld [vmem:[%s3165_s12 + $0x10] sm:$0xff]  }
 0x601   :  { %v617_v56 = vpop.f32.mrb[12].mxu1  ;;  %v2108_v54 = vld [vmem:[%s3164_s11] ss:$0 sm:$0xff] }
 0x602   :  { %676 = vrot.lane.b32.xlu1 %v672_v52, %s2594_s27  ;;  %v2300_v57 = vpop.f32.mrb[13].mxu1  ;;  %v2456_v52 = vld [vmem:[%s3165_s12 + $0x18] sm:$0xff]  }
 0x603   :  { %v620_v58 = vpop.f32.mrb[14].mxu1 }
 0x604   :  { %v673_v59 = vpack.c.bf16 %v620_v58, %v617_v56  ;;  %v2301_v60 = vpop.f32.mrb[15].mxu1 }
 0x605   :  { %v664_v61 = vpop.f32.mrb[16].mxu0 }
 0x606   :  { %679 = vrot.lane.b32.xlu0 %v673_v59, %s2595_s28  ;;  %v2306_v62 = vpop.f32.mrb[17].mxu0 }
 0x607   :  { %v667_v63 = vpop.f32.mrb[18].mxu0 }
 0x608   :  { %v674_v0 = vpack.c.bf16 %v667_v63, %v664_v61  ;;  %v2307_v1 = vpop.f32.mrb[19].mxu0 }
 0x60a   :  { %682 = vrot.lane.b32.xlu1 %v674_v0, %s3177_s4 }
 0x674   :  { %v677_v2 = vpop.permute.xlu1 %676 }
 0x675   :  { %v686_v4 = vsel %vm195_vm2, %v671_v45, %v677_v2 }
 0x678   :  { %v680_v3 = vpop.permute.xlu0 %679 }
 0x679   :  { %v688_v5 = vsel %vm390_vm3, %v686_v4, %v680_v3 }
 0x67c   :  { %v683_v6 = vpop.permute.xlu1 %682 }
 0x67d   :  { %v691_v7 = vsel %vm689_vm4, %v688_v5, %v683_v6 }
 0x67e   :  { %2313 = vmatmul.mubr.msk.bf16.vlgmr.msra.gmra.mrb[16].mxu1 %vm73_vm0, %v691_v7 }
 0x67f   :  { %2332 = vmatprep.mubr.msk.bf16.mxu1 %vm2588_vm1, %v2587_v15  ;;  %2325 = vmatpush3.bf16.msra.mxu1 %v2453_v49 }
 0x680   :  { %2326 = vmatprep.subr.bf16.mxu1 %v2587_v15 }
 0x683   :  { %2327 = vmatpush3.bf16.msra.mxu1 %v2454_v50 }
 0x684   :  { %2328 = vmatprep.subr.bf16.mxu1 %v2587_v15 }
 0x687   :  { %2329 = vmatpush3.bf16.msra.mxu1 %v2455_v51 }
 0x688   :  { %2330 = vmatprep.subr.bf16.mxu1 %v2587_v15 }
 0x68b   :  { %2331 = vmatpush3.bf16.msra.mxu1 %v2456_v52 }
 0x68c   :  { %2350 = vmatprep.subr.bf16.mxu1 %v2587_v15 }
 0x751   :  { %v751_v9 = vpop.f32.mrb[16].mxu1 }
 0x752   :  { %v752_v10 = vadd.f32 %v2102_v8, %v751_v9  ;;  %v2314_v11 = vpop.f32.mrb[17].mxu1 }
 0x753   :  { %v754_v12 = vpop.f32.mrb[18].mxu1 }
 0x754   :  { %v755_v13 = vadd.f32 %v2102_v8, %v754_v12  ;;  %v2315_v14 = vpop.f32.mrb[19].mxu1  ;;  %v758_v42 = vadd.f32 %v752_v10, %v2733_v31 }
 0x756   :  { %v762_v44 = vsel %vm73_vm0, %v758_v42, 0.0  ;;  %v759_v16 = vadd.f32 %v755_v13, %v2735_v32  ;;  %v2451_v32 = vld [vmem:[%s3163_s10] sm:$0xff]  }
 0x757   :  { %763 = vadd.xlane.f32.xlu0 %v762_v44  ;;  %2317 = vmatpush3.bf16.msra.mxu0 %v2451_v32 }
 0x758   :  { %v765_v43 = vsel %vm73_vm0, %v759_v16, 0.0  ;;  %2318 = vmatprep.subr.bf16.mxu0 %v2587_v15 }
 0x759   :  { %766 = vadd.xlane.f32.xlu1 %v765_v43 }
 0x75b   :  { %2319 = vmatpush3.bf16.msra.mxu0 %v2452_v26 }
 0x75c   :  { %2336 = vmatprep.subr.bf16.mxu0 %v2587_v15 }
 0x7e4   :  { %v764_v17 = vpop.xlane.xlu0 %763 }
 0x7e5   :  { %v768_v18 = vmul.f32 0.03125, %v764_v17 }
 0x7e6   :  { %v767_v19 = vpop.xlane.xlu1 %766 }
 0x7e7   :  { %v770_v20 = vsub.f32 %v758_v42, %v768_v18  ;;  %v769_v21 = vmul.f32 0.03125, %v767_v19 }
 0x7e9   :  { %v771_v22 = vsub.f32 %v759_v16, %v769_v21  ;;  %v772_v23 = vmul.f32 %v770_v20, %v770_v20  ;;  %v2112_v16 = vld [vmem:[%s3166_s13] ss:$0 sm:$0xff] }
 0x7eb   :  { %v774_v24 = vsel %vm73_vm0, %v772_v23, 0.0  ;;  %v773_v25 = vmul.f32 %v771_v22, %v771_v22 }
 0x7ec   :  { %775 = vadd.xlane.f32.xlu0 %v774_v24 }
 0x7ed   :  { %v777_v31 = vsel %vm73_vm0, %v773_v25, 0.0 }
 0x7f0   :  { %778 = vadd.xlane.f32.xlu0 %v777_v31 }
 0x879   :  { %v776_v27 = vpop.xlane.xlu0 %775 }
 0x87a   :  { %v780_v28 = vmul.f32 0.03125, %v776_v27 }
 0x87c   :  { %v782_v29 = vadd.f32 1e-12, %v780_v28 }
 0x87d   :  { %v779_v30 = vpop.xlane.xlu0 %778 }
 0x87e   :  { %2507 = vrsqrt.f32 %v782_v29  ;;  %v781_v33 = vmul.f32 0.03125, %v779_v30 }
 0x880   :  { %v783_v34 = vadd.f32 1e-12, %v781_v33 }
 0x882   :  { %2509 = vrsqrt.f32 %v783_v34 }
 0x888   :  { %v2508_v35 = vpop.eup %2507 }
 0x889   :  { %v786_v36 = vmul.f32 %v2508_v35, %v770_v20 }
 0x88b   :  { %v794_v39 = vmul.f32 %v2106_v37, %v786_v36  ;;  %v2457_v36 = vld [vmem:[%s3184_s26 + $0x10] sm:$0xff]  }
 0x88c   :  { %v2510_v38 = vpop.eup %2509 }
 0x88d   :  { %v787_v40 = vmul.f32 %v2510_v38, %v771_v22  ;;  %v802_v46 = vadd.f32 %v2107_v41, %v794_v39 }
 0x88f   :  { %v795_v45 = vmul.f32 %v2106_v37, %v787_v40  ;;  %v2458_v37 = vld [vmem:[%s3184_s26 + $0x18] sm:$0xff]  }
 0x891   :  { %v803_v47 = vadd.f32 %v2107_v41, %v795_v45 }
 0x893   :  { %v804_v48 = vpack.c.bf16 %v803_v47, %v802_v46 }
 0x895   :  { %2321 = vmatmul.mubr.msk.bf16.vlgmr.msra.gmra.mrb[20].mxu0 %vm73_vm0, %v804_v48  ;;  %v2118_v48 = vld [vmem:[%s3167_s14] ss:$0 sm:$0xff] }
 0x896   :  { %2340 = vmatprep.mubr.msk.bf16.mxu0 %vm2588_vm1, %v2587_v15  ;;  %2337 = vmatpush3.bf16.msra.mxu0 %v2457_v36 }
 0x897   :  { %2338 = vmatprep.subr.bf16.mxu0 %v2587_v15 }
 0x89a   :  { %2339 = vmatpush3.bf16.msra.mxu0 %v2458_v37 }
 0x89b   :  { %2344 = vmatprep.subr.bf16.mxu0 %v2587_v15 }
 0x968   :  { %v865_v56 = vpop.f32.mrb[20].mxu0 }
 0x969   :  { %v866_v57 = vadd.f32 %v2108_v54, %v865_v56  ;;  %v2322_v58 = vpop.f32.mrb[21].mxu0 }
 0x96a   :  { %v868_v59 = vpop.f32.mrb[22].mxu0 }
 0x96b   :  { %v872_v60 = vmul.f32 %v866_v57, %v866_v57  ;;  %v869_v61 = vadd.f32 %v2108_v54, %v868_v59  ;;  %v2323_v62 = vpop.f32.mrb[23].mxu0  ;;  %v2119_v54 = vld [vmem:[%s3168_s15] ss:$0 sm:$0xff] }
 0x96d   :  { %v874_v63 = vmul.f32 %v872_v60, %v866_v57  ;;  %v873_v0 = vmul.f32 %v869_v61, %v869_v61  ;;  %v2125_v60 = vld [vmem:[%s3158_s5 + $0x1] ss:$0 sm:$0xff] }
 0x96f   :  { %v876_v1 = vmul.f32 0.044715, %v874_v63  ;;  %v875_v2 = vmul.f32 %v873_v0, %v869_v61 }
 0x971   :  { %v878_v3 = vadd.f32 %v876_v1, %v866_v57  ;;  %v877_v4 = vmul.f32 0.044715, %v875_v2 }
 0x973   :  { %v880_v5 = vmul.f32 0.7978846, %v878_v3  ;;  %v879_v6 = vadd.f32 %v877_v4, %v869_v61 }
 0x975   :  { %2511 = vtanh.f32 %v880_v5  ;;  %v881_v7 = vmul.f32 0.7978846, %v879_v6 }
 0x977   :  { %2513 = vtanh.f32 %v881_v7 }
 0x97f   :  { %v2512_v8 = vpop.eup %2511 }
 0x980   :  { %v884_v9 = vadd.f32 1.0, %v2512_v8 }
 0x981   :  { %v2514_v10 = vpop.eup %2513 }
 0x982   :  { %v886_v11 = vmul.f32 0.5, %v884_v9  ;;  %v885_v12 = vadd.f32 1.0, %v2514_v10 }
 0x984   :  { %v887_v13 = vmul.f32 0.5, %v885_v12  ;;  %v888_v14 = vmul.f32 %v886_v11, %v866_v57 }
 0x986   :  { %v889_v42 = vmul.f32 %v887_v13, %v869_v61 }
 0x988   :  { %v890_v44 = vpack.c.bf16 %v889_v42, %v888_v14 }
 0x98a   :  { %2333 = vmatmul.mubr.msk.bf16.vlgmr.msra.gmra.mrb[20].mxu1 %vm930_vm5, %v890_v44 }
 0x98b   :  { %2352 = vmatprep.mubr.msk.bf16.mxu1 %vm2588_vm1, %v2587_v15 }
 0xa5d   :  { %v968_v43 = vpop.f32.mrb[20].mxu1 }
 0xa5e   :  { %v969_v17 = vadd.f32 %v2112_v16, %v968_v43  ;;  %v2334_v18 = vpop.f32.mrb[21].mxu1 }
 0xa5f   :  { %v971_v19 = vpop.f32.mrb[22].mxu1 }
 0xa60   :  { %v972_v20 = vadd.f32 %v2112_v16, %v971_v19  ;;  %v2335_v21 = vpop.f32.mrb[23].mxu1  ;;  %v975_v22 = vadd.f32 %v969_v17, %v802_v46 }
 0xa62   :  { %v979_v23 = vsel %vm73_vm0, %v975_v22, 0.0  ;;  %v976_v24 = vadd.f32 %v972_v20, %v803_v47 }
 0xa63   :  { %980 = vadd.xlane.f32.xlu0 %v979_v23 }
 0xa64   :  { %v982_v25 = vsel %vm73_vm0, %v976_v24, 0.0 }
 0xa65   :  { %983 = vadd.xlane.f32.xlu1 %v982_v25 }
 0xaf0   :  { %v981_v31 = vpop.xlane.xlu0 %980 }
 0xaf1   :  { %v985_v32 = vmul.f32 0.03125, %v981_v31 }
 0xaf2   :  { %v984_v26 = vpop.xlane.xlu1 %983 }
 0xaf3   :  { %v987_v27 = vsub.f32 %v975_v22, %v985_v32  ;;  %v986_v28 = vmul.f32 0.03125, %v984_v26 }
 0xaf5   :  { %v988_v29 = vsub.f32 %v976_v24, %v986_v28  ;;  %v989_v30 = vmul.f32 %v987_v27, %v987_v27 }
 0xaf7   :  { %v991_v33 = vsel %vm73_vm0, %v989_v30, 0.0  ;;  %v990_v34 = vmul.f32 %v988_v29, %v988_v29 }
 0xaf8   :  { %992 = vadd.xlane.f32.xlu0 %v991_v33 }
 0xaf9   :  { %v994_v35 = vsel %vm73_vm0, %v990_v34, 0.0 }
 0xafa   :  { %995 = vadd.xlane.f32.xlu1 %v994_v35 }
 0xb85   :  { %v993_v38 = vpop.xlane.xlu0 %992 }
 0xb86   :  { %v997_v39 = vmul.f32 0.03125, %v993_v38 }
 0xb87   :  { %v996_v40 = vpop.xlane.xlu1 %995 }
 0xb88   :  { %v999_v41 = vadd.f32 1e-12, %v997_v39  ;;  %v998_v45 = vmul.f32 0.03125, %v996_v40 }
 0xb8a   :  { %2515 = vrsqrt.f32 %v999_v41  ;;  %v1000_v46 = vadd.f32 1e-12, %v998_v45 }
 0xb8c   :  { %2517 = vrsqrt.f32 %v1000_v46 }
 0xb94   :  { %v2516_v47 = vpop.eup %2515 }
 0xb95   :  { %v1003_v49 = vmul.f32 %v2516_v47, %v987_v27 }
 0xb96   :  { %v2518_v50 = vpop.eup %2517 }
 0xb97   :  { %v1011_v51 = vmul.f32 %v2118_v48, %v1003_v49  ;;  %v1004_v52 = vmul.f32 %v2518_v50, %v988_v29 }
 0xb99   :  { %v1012_v56 = vmul.f32 %v2118_v48, %v1004_v52  ;;  %v2935_v57 = vadd.f32 %v2119_v54, %v1011_v51 }
 0xb9b   :  { %v2937_v58 = vadd.f32 %v2119_v54, %v1012_v56 }
 0xb9d   :  { %v1021_v59 = vpack.c.bf16 %v2937_v58, %v2935_v57 }
 0xb9f   :  { %2341 = vmatmul.mubr.msk.bf16.vlgmr.msra.gmra.mrb[24].mxu0 %vm73_vm0, %v1021_v59 }
 0xba0   :  { %2346 = vmatprep.mubr.msk.bf16.mxu0 %vm2588_vm1, %v2587_v15 }
 0xc72   :  { %v1084_v61 = vpop.f32.mrb[24].mxu0 }
 0xc73   :  { %v2342_v62 = vpop.f32.mrb[25].mxu0  ;;  %v1085_v0 = vadd.f32 %v2125_v60, %v1084_v61 }
 0xc74   :  { %v1087_v63 = vpop.f32.mrb[26].mxu0 }
 0xc75   :  { %v1088_v1 = vadd.f32 %v2125_v60, %v1087_v63  ;;  %v2343_v2 = vpop.f32.mrb[27].mxu0 }
 0xc77   :  { %v2947_v3 = vpack.c.bf16 %v1088_v1, %v1085_v0 }
 0xc79   :  { %1095 = vrot.lane.b32.xlu1 %v2947_v3, %s2589_s24  ;;  %1093 = vrot.lane.b32.xlu0 %v2947_v3, %s2590_s2 }
 0xc7d   :  { %1097 = vrot.lane.b32.xlu1 %v2947_v3, %s2591_s25 }
 0xc81   :  { %1099 = vrot.lane.b32.xlu1 %v2947_v3, %s2592_s3 }
 0xceb   :  { %v2957_v4 = vpop.permute.xlu1 %1095  ;;  %v2959_v5 = vpop.permute.xlu0 %1093 }
 0xcec   :  { %1197 = vrot.lane.b32.xlu1 %v2957_v4, %s2592_s3  ;;  %1148 = vrot.lane.b32.xlu0 %v2959_v5, %s2592_s3 }
 0xcef   :  { %v2965_v6 = vpop.permute.xlu1 %1097 }
 0xcf0   :  { %1246 = vrot.lane.b32.xlu0 %v2965_v6, %s2592_s3 }
 0xcf3   :  { %v1100_v7 = vpop.permute.xlu1 %1099 }
 0xcf4   :  { %v1105_v8 = vsel %vm195_vm2, %v1100_v7, 0 }
 0xcf5   :  { %2345 = vmatpush3.bf16.xpose.msra.mxu0 %v1105_v8 }
 0xcf6   :  { %2356 = vmatprep.subr.bf16.mxu0 %v2587_v15 }
 0xcfc   :  { %2347 = vmatmul.mubr.msk.bf16.vlgmr.msra.gmra.mrb[28].mxu0 %vm195_vm2, %v2947_v3 }
 0xcfd   :  { %2358 = vmatprep.mubr.msk.bf16.mxu0 %vm2588_vm1, %v2587_v15 }
 0xd5e   :  { %v1198_v9 = vpop.permute.xlu1 %1197  ;;  %v1149_v10 = vpop.permute.xlu0 %1148 }
 0xd5f   :  { %v1203_v11 = vsel %vm195_vm2, %v1198_v9, 0  ;;  %v1154_v12 = vsel %vm195_vm2, %v1149_v10, 0 }
 0xd60   :  { %2351 = vmatpush3.bf16.xpose.msra.mxu1 %v1154_v12  ;;  %2357 = vmatpush3.bf16.xpose.msra.mxu0 %v1203_v11 }
 0xd61   :  { %2362 = vmatprep.subr.bf16.mxu1 %v2587_v15  ;;  %2368 = vmatprep.subr.bf16.mxu0 %v2587_v15 }
 0xd62   :  { %v1247_v13 = vpop.permute.xlu0 %1246 }
 0xd63   :  { %v1252_v14 = vsel %vm195_vm2, %v1247_v13, 0 }
 0xd67   :  { %2353 = vmatmul.mubr.msk.bf16.vlgmr.msra.gmra.mrb[24].mxu1 %vm195_vm2, %v2959_v5  ;;  %2359 = vmatmul.mubr.msk.bf16.vlgmr.msra.gmra.mrb[32].mxu0 %vm195_vm2, %v2957_v4 }
 0xd68   :  { %2363 = vmatpush3.bf16.xpose.msra.mxu1 %v1252_v14  ;;  %2364 = vmatprep.mubr.msk.bf16.mxu1 %vm2588_vm1, %v2587_v15 }
 0xd69   :  { %2370 = vmatprep.mubr.msk.bf16.mxu0 %vm2588_vm1, %v2587_v15  ;;  %2374 = vmatprep.subr.bf16.mxu1 %v2587_v15 }
 0xd6f   :  { %2365 = vmatmul.mubr.msk.bf16.vlgmr.msra.gmra.mrb[28].mxu1 %vm195_vm2, %v2965_v6 }
 0xd70   :  { %2376 = vmatprep.mubr.msk.bf16.mxu1 %vm2588_vm1, %v2587_v15 }
 0xdcf   :  { %v1141_v42 = vpop.f32.mrb[28].mxu0 }
 0xdd0   :  { %v1142_v44 = vadd.f32 %v1141_v42, %v2794_v53  ;;  %v2348_v16 = vpop.f32.mrb[29].mxu0 }
 0xdd1   :  { %v1144_v43 = vpop.f32.mrb[30].mxu0 }
 0xdd2   :  { %v1145_v17 = vadd.f32 %v1144_v43, %v2799_v55  ;;  %v2349_v18 = vpop.f32.mrb[31].mxu0  ;;  %v1295_v19 = vsel %vm390_vm3, %v1142_v44, -inf }
 0xdd3   :  { %1296 = vmax.xlane.f32.xlu1 %v1295_v19 }
 0xdd4   :  { %v1298_v20 = vsel %vm390_vm3, %v1145_v17, -inf }
 0xdd5   :  { %1299 = vmax.xlane.f32.xlu0 %v1298_v20 }
 0xe3a   :  { %v1190_v21 = vpop.f32.mrb[24].mxu1  ;;  %v1239_v22 = vpop.f32.mrb[32].mxu0 }
 0xe3b   :  { %v1191_v23 = vadd.f32 %v1190_v21, %v2794_v53  ;;  %v1240_v24 = vadd.f32 %v1239_v22, %v2794_v53  ;;  %v2354_v25 = vpop.f32.mrb[25].mxu1  ;;  %v2360_v31 = vpop.f32.mrb[33].mxu0 }
 0xe3c   :  { %v1193_v32 = vpop.f32.mrb[26].mxu1  ;;  %v1242_v26 = vpop.f32.mrb[34].mxu0 }
 0xe3d   :  { %v1194_v27 = vadd.f32 %v1193_v32, %v2799_v55  ;;  %v2355_v28 = vpop.f32.mrb[27].mxu1  ;;  %v2361_v29 = vpop.f32.mrb[35].mxu0  ;;  %v1307_v30 = vsel %vm390_vm3, %v1240_v24, -inf  ;;  %v1301_v33 = vsel %vm390_vm3, %v1191_v23, -inf  ;;  %v1243_v34 = vadd.f32 %v1242_v26, %v2799_v55 }
 0xe3e   :  { %1308 = vmax.xlane.f32.xlu1 %v1307_v30  ;;  %1302 = vmax.xlane.f32.xlu0 %v1301_v33 }
 0xe3f   :  { %v1304_v35 = vsel %vm390_vm3, %v1194_v27, -inf  ;;  %v1310_v45 = vsel %vm390_vm3, %v1243_v34, -inf }
 0xe42   :  { %1305 = vmax.xlane.f32.xlu0 %v1304_v35  ;;  %v1288_v36 = vpop.f32.mrb[28].mxu1 }
 0xe43   :  { %v1289_v37 = vadd.f32 %v1288_v36, %v2794_v53  ;;  %v2366_v38 = vpop.f32.mrb[29].mxu1 }
 0xe44   :  { %v1291_v39 = vpop.f32.mrb[30].mxu1 }
 0xe45   :  { %v1292_v40 = vadd.f32 %v1291_v39, %v2799_v55  ;;  %v2367_v41 = vpop.f32.mrb[31].mxu1  ;;  %v1313_v46 = vsel %vm390_vm3, %v1289_v37, -inf }
 0xe46   :  { %1311 = vmax.xlane.f32.xlu0 %v1310_v45  ;;  %1314 = vmax.xlane.f32.xlu1 %v1313_v46 }
 0xe47   :  { %v1316_v47 = vsel %vm390_vm3, %v1292_v40, -inf }
 0xe4a   :  { %1317 = vmax.xlane.f32.xlu0 %v1316_v47 }
 0xe57   :  { %1387 = vrot.lane.b32.xlu1 %v2947_v3, %s2593_s0 }
 0xe60   :  { %v1297_v48 = vpop.xlane.xlu1 %1296 }
 0xe61   :  { %v1319_v50 = vsub.f32 %v1142_v44, %v1297_v48 }
 0xe62   :  { %v1300_v49 = vpop.xlane.xlu0 %1299 }
 0xe63   :  { %v1320_v53 = vsub.f32 %v1145_v17, %v1300_v49  ;;  %v1327_v55 = vmul.f32 1.442695, %v1319_v50 }
 0xe65   :  { %v1329_v51 = vmul.f32 1.442695, %v1320_v53 }
 0xe67   :  { %2519 = vpow2.f32 %v1329_v51 }
 0xe68   :  { %2521 = vpow2.f32 %v1327_v55 }
 0xe71   :  { %v2520_v52 = vpop.eup %2519 }
 0xe72   :  { %v1346_v54 = vsel %vm390_vm3, %v2520_v52, 0.0  ;;  %v2522_v56 = vpop.eup %2521 }
 0xe73   :  { %1347 = vadd.xlane.f32.xlu0 %v1346_v54  ;;  %v1343_v59 = vsel %vm390_vm3, %v2522_v56, 0.0 }
 0xe7b   :  { %1344 = vadd.xlane.f32.xlu1 %v1343_v59 }
 0xecb   :  { %v1309_v60 = vpop.xlane.xlu1 %1308  ;;  %v1303_v61 = vpop.xlane.xlu0 %1302 }
 0xecc   :  { %v1323_v62 = vsub.f32 %v1240_v24, %v1309_v60  ;;  %v1321_v63 = vsub.f32 %v1191_v23, %v1303_v61 }
 0xece   :  { %v1331_v0 = vmul.f32 1.442695, %v1321_v63  ;;  %v1335_v1 = vmul.f32 1.442695, %v1323_v62 }
 0xecf   :  { %v1306_v2 = vpop.xlane.xlu0 %1305 }
 0xed0   :  { %v1322_v3 = vsub.f32 %v1194_v27, %v1306_v2  ;;  %2523 = vpow2.f32 %v1331_v0  ;;  %v2459_v2 = vld [vmem:[%s3159_s6 + $0x10] sm:$0xff]  }
 0xed1   :  { %2525 = vpow2.f32 %v1335_v1 }
 0xed2   :  { %v1333_v7 = vmul.f32 1.442695, %v1322_v3  ;;  %v2460_v3 = vld [vmem:[%s3159_s6 + $0x18] sm:$0xff]   ;;  %s3188_s6 = smov 24  }
 0xed3   :  { %v1312_v8 = vpop.xlane.xlu0 %1311  ;;  %v1315_v9 = vpop.xlane.xlu1 %1314 }
 0xed4   :  { %2527 = vpow2.f32 %v1333_v7  ;;  %v1324_v10 = vsub.f32 %v1243_v34, %v1312_v8  ;;  %v1325_v11 = vsub.f32 %v1289_v37, %v1315_v9 }
 0xed6   :  { %v1337_v12 = vmul.f32 1.442695, %v1324_v10  ;;  %v1339_v13 = vmul.f32 1.442695, %v1325_v11 }
 0xed7   :  { %v1388_v14 = vpop.permute.xlu1 %1387  ;;  %v1318_v42 = vpop.xlane.xlu0 %1317 }
 0xed8   :  { %2529 = vpow2.f32 %v1337_v12  ;;  %v1326_v44 = vsub.f32 %v1292_v40, %v1318_v42  ;;  %2369 = vmatpush3.bf16.msra.mxu0 %v1388_v14 }
 0xed9   :  { %2531 = vpow2.f32 %v1339_v13  ;;  %2380 = vmatprep.subr.bf16.mxu0 %v2587_v15 }
 0xeda   :  { %v1341_v16 = vmul.f32 1.442695, %v1326_v44  ;;  %v2524_v43 = vpop.eup %2523 }
 0xedb   :  { %v1349_v17 = vsel %vm390_vm3, %v2524_v43, 0.0  ;;  %v2526_v18 = vpop.eup %2525 }
 0xedc   :  { %2533 = vpow2.f32 %v1341_v16  ;;  %1350 = vadd.xlane.f32.xlu1 %v1349_v17  ;;  %v1355_v21 = vsel %vm390_vm3, %v2526_v18, 0.0 }
 0xede   :  { %v2528_v19 = vpop.eup %2527 }
 0xedf   :  { %v1352_v20 = vsel %vm390_vm3, %v2528_v19, 0.0 }
 0xee0   :  { %1353 = vadd.xlane.f32.xlu0 %v1352_v20  ;;  %1356 = vadd.xlane.f32.xlu1 %v1355_v21 }
 0xee2   :  { %v2530_v22 = vpop.eup %2529 }
 0xee3   :  { %v2532_v23 = vpop.eup %2531  ;;  %v1358_v24 = vsel %vm390_vm3, %v2530_v22, 0.0 }
 0xee4   :  { %v1361_v25 = vsel %vm390_vm3, %v2532_v23, 0.0  ;;  %1359 = vadd.xlane.f32.xlu0 %v1358_v24 }
 0xee5   :  { %1362 = vadd.xlane.f32.xlu1 %v1361_v25 }
 0xee6   :  { %v2534_v31 = vpop.eup %2533 }
 0xee7   :  { %v1364_v32 = vsel %vm390_vm3, %v2534_v31, 0.0 }
 0xee8   :  { %1365 = vadd.xlane.f32.xlu0 %v1364_v32 }
 0xef6   :  { %1481 = vrot.lane.b32.xlu1 %v2957_v4, %s2593_s0 }
 0xefa   :  { %1528 = vrot.lane.b32.xlu1 %v2965_v6, %s2593_s0 }
 0xefe   :  { %1434 = vrot.lane.b32.xlu0 %v2959_v5, %s2593_s0 }
 0xf00   :  { %v1348_v26 = vpop.xlane.xlu0 %1347 }
 0xf01   :  { %2535 = vrcp.f32 %v1348_v26 }
 0xf08   :  { %v1345_v27 = vpop.xlane.xlu1 %1344 }
 0xf09   :  { %2537 = vrcp.f32 %v1345_v27 }
 0xf0b   :  { %v2536_v28 = vpop.eup %2535 }
 0xf0c   :  { %v1376_v30 = vmul.f32 %v2536_v28, %v2520_v52 }
 0xf13   :  { %v2538_v29 = vpop.eup %2537 }
 0xf14   :  { %v1375_v33 = vmul.f32 %v2538_v29, %v2522_v56 }
 0xf16   :  { %v1383_v34 = vpack.c.bf16 %v1376_v30, %v1375_v33 }
 0xf18   :  { %2371 = vmatmul.mubr.msk.bf16.vlgmr.msra.gmra.mrb[36].mxu0 %vm390_vm3, %v1383_v34 }
 0xf19   :  { %2382 = vmatprep.mubr.msk.bf16.mxu0 %vm2588_vm1, %v2587_v15 }
 0xf69   :  { %v1351_v4 = vpop.xlane.xlu1 %1350 }
 0xf6a   :  { %2539 = vrcp.f32 %v1351_v4 }
 0xf6d   :  { %v1354_v6 = vpop.xlane.xlu0 %1353  ;;  %v1357_v35 = vpop.xlane.xlu1 %1356 }
 0xf6e   :  { %2541 = vrcp.f32 %v1354_v6 }
 0xf6f   :  { %2543 = vrcp.f32 %v1357_v35 }
 0xf71   :  { %v1360_v5 = vpop.xlane.xlu0 %1359 }
 0xf72   :  { %v1363_v36 = vpop.xlane.xlu1 %1362  ;;  %2545 = vrcp.f32 %v1360_v5 }
 0xf73   :  { %2547 = vrcp.f32 %v1363_v36 }
 0xf74   :  { %v2540_v38 = vpop.eup %2539 }
 0xf75   :  { %v1366_v37 = vpop.xlane.xlu0 %1365  ;;  %v1377_v41 = vmul.f32 %v2540_v38, %v2524_v43 }
 0xf76   :  { %v1482_v39 = vpop.permute.xlu1 %1481  ;;  %2549 = vrcp.f32 %v1366_v37 }
 0xf77   :  { %2381 = vmatpush3.bf16.msra.mxu0 %v1482_v39 }
 0xf78   :  { %v2542_v40 = vpop.eup %2541  ;;  %2392 = vmatprep.subr.bf16.mxu0 %v2587_v15 }
 0xf79   :  { %v1378_v45 = vmul.f32 %v2542_v40, %v2528_v19  ;;  %v1435_v46 = vpop.permute.xlu0 %1434  ;;  %v2544_v47 = vpop.eup %2543 }
 0xf7a   :  { %2375 = vmatpush3.bf16.msra.mxu1 %v1435_v46  ;;  %v1379_v53 = vmul.f32 %v2544_v47, %v2526_v18  ;;  %v1529_v51 = vpop.permute.xlu1 %1528  ;;  %v2462_v46 = vld [vmem:[%s3163_s10 + $0x18] sm:$0xff]  }
 0xf7b   :  { %v1384_v48 = vpack.c.bf16 %v1378_v45, %v1377_v41  ;;  %2386 = vmatprep.subr.bf16.mxu1 %v2587_v15 }
 0xf7c   :  { %v2546_v49 = vpop.eup %2545 }
 0xf7d   :  { %v1380_v50 = vmul.f32 %v2546_v49, %v2530_v22  ;;  %2377 = vmatmul.mubr.msk.bf16.vlgmr.msra.gmra.mrb[32].mxu1 %vm390_vm3, %v1384_v48  ;;  %v2548_v55 = vpop.eup %2547 }
 0xf7e   :  { %2387 = vmatpush3.bf16.msra.mxu1 %v1529_v51  ;;  %2388 = vmatprep.mubr.msk.bf16.mxu1 %vm2588_vm1, %v2587_v15  ;;  %v1381_v56 = vmul.f32 %v2548_v55, %v2532_v23 }
 0xf7f   :  { %v1385_v52 = vpack.c.bf16 %v1380_v50, %v1379_v53  ;;  %2400 = vmatprep.subr.bf16.mxu1 %v2587_v15 }
 0xf80   :  { %v2550_v54 = vpop.eup %2549 }
 0xf81   :  { %v1382_v59 = vmul.f32 %v2550_v54, %v2534_v31  ;;  %2383 = vmatmul.mubr.msk.bf16.vlgmr.msra.gmra.mrb[40].mxu0 %vm390_vm3, %v1385_v52  ;;  %v2142_v31 = vld [vmem:[%s3160_s7 + $0x1] ss:$0 sm:$0xff] }
 0xf82   :  { %2396 = vmatprep.mubr.msk.bf16.mxu0 %vm2588_vm1, %v2587_v15  ;;  %2393 = vmatpush3.bf16.msra.mxu0 %v2459_v2  ;;  %v2148_v54 = vld [vmem:[%s3161_s8 + $0x1] ss:$0 sm:$0xff] }
 0xf83   :  { %v1386_v60 = vpack.c.bf16 %v1382_v59, %v1381_v56  ;;  %2394 = vmatprep.subr.bf16.mxu0 %v2587_v15  ;;  %v2463_v2 = vld [vmem:[%s3165_s12 + $0x20] sm:$0xff]  }
 0xf85   :  { %2389 = vmatmul.mubr.msk.bf16.vlgmr.msra.gmra.mrb[36].mxu1 %vm390_vm3, %v1386_v60 }
 0xf86   :  { %2404 = vmatprep.mubr.msk.bf16.mxu1 %vm2588_vm1, %v2587_v15  ;;  %2395 = vmatpush3.bf16.msra.mxu0 %v2460_v3  ;;  %v2464_v3 = vld [vmem:[%s3165_s12 + $0x28] sm:$0xff]  }
 0xf87   :  { %2408 = vmatprep.subr.bf16.mxu0 %v2587_v15 }
 0xfeb   :  { %v1427_v61 = vpop.f32.mrb[36].mxu0 }
 0xfec   :  { %v2372_v62 = vpop.f32.mrb[37].mxu0 }
 0xfed   :  { %v1430_v63 = vpop.f32.mrb[38].mxu0 }
 0xfee   :  { %v1575_v0 = vpack.c.bf16 %v1430_v63, %v1427_v61  ;;  %v2373_v1 = vpop.f32.mrb[39].mxu0  ;;  %v2149_v61 = vld [vmem:[%s3162_s9 + $0x1] ss:$0 sm:$0xff] }
0x1050   :  { %v1474_v7 = vpop.f32.mrb[32].mxu1 }
0x1051   :  { %v2378_v8 = vpop.f32.mrb[33].mxu1 }
0x1052   :  { %v1477_v9 = vpop.f32.mrb[34].mxu1  ;;  %v2466_v8 = vld [vmem:[%s3165_s12 + $0x38] sm:$0xff]  }
0x1053   :  { %v1576_v10 = vpack.c.bf16 %v1477_v9, %v1474_v7  ;;  %v2379_v11 = vpop.f32.mrb[35].mxu1  ;;  %v2465_v7 = vld [vmem:[%s3165_s12 + $0x30] sm:$0xff]   ;;  %v2155_v9 = vld [vmem:[%s3164_s11 + $0x1] ss:$0 sm:$0xff] }
0x1054   :  { %v1521_v12 = vpop.f32.mrb[40].mxu0 }
0x1055   :  { %v2384_v13 = vpop.f32.mrb[41].mxu0  ;;  %1580 = vrot.lane.b32.xlu1 %v1576_v10, %s2594_s27 }
0x1056   :  { %v1524_v14 = vpop.f32.mrb[42].mxu0 }
0x1057   :  { %v1577_v42 = vpack.c.bf16 %v1524_v14, %v1521_v12  ;;  %v2385_v44 = vpop.f32.mrb[43].mxu0 }
0x1058   :  { %v1568_v16 = vpop.f32.mrb[36].mxu1 }
0x1059   :  { %1583 = vrot.lane.b32.xlu0 %v1577_v42, %s2595_s28  ;;  %v2390_v43 = vpop.f32.mrb[37].mxu1 }
0x105a   :  { %v1571_v17 = vpop.f32.mrb[38].mxu1 }
0x105b   :  { %v1578_v18 = vpack.c.bf16 %v1571_v17, %v1568_v16  ;;  %v2391_v19 = vpop.f32.mrb[39].mxu1 }
0x105d   :  { %1586 = vrot.lane.b32.xlu1 %v1578_v18, %s3188_s6 }
0x10c7   :  { %v1581_v20 = vpop.permute.xlu1 %1580 }
0x10c8   :  { %v1590_v22 = vsel %vm195_vm2, %v1575_v0, %v1581_v20 }
0x10cb   :  { %v1584_v21 = vpop.permute.xlu0 %1583 }
0x10cc   :  { %v1592_v23 = vsel %vm390_vm3, %v1590_v22, %v1584_v21 }
0x10cf   :  { %v1587_v24 = vpop.permute.xlu1 %1586 }
0x10d0   :  { %v1594_v25 = vsel %vm689_vm4, %v1592_v23, %v1587_v24 }
0x10d1   :  { %2397 = vmatmul.mubr.msk.bf16.vlgmr.msra.gmra.mrb[44].mxu0 %vm73_vm0, %v1594_v25 }
0x10d2   :  { %2416 = vmatprep.mubr.msk.bf16.mxu0 %vm2588_vm1, %v2587_v15  ;;  %2409 = vmatpush3.bf16.msra.mxu0 %v2463_v2 }
0x10d3   :  { %2410 = vmatprep.subr.bf16.mxu0 %v2587_v15 }
0x10d6   :  { %2411 = vmatpush3.bf16.msra.mxu0 %v2464_v3 }
0x10d7   :  { %2412 = vmatprep.subr.bf16.mxu0 %v2587_v15 }
0x10da   :  { %2413 = vmatpush3.bf16.msra.mxu0 %v2465_v7 }
0x10db   :  { %2414 = vmatprep.subr.bf16.mxu0 %v2587_v15 }
0x10de   :  { %2415 = vmatpush3.bf16.msra.mxu0 %v2466_v8  ;;  %v2177_v8 = vld [vmem:[%s3168_s15 + $0x1] ss:$0 sm:$0xff] }
0x11a4   :  { %v1656_v32 = vpop.f32.mrb[44].mxu0 }
0x11a5   :  { %v1657_v26 = vadd.f32 %v2142_v31, %v1656_v32  ;;  %v2398_v27 = vpop.f32.mrb[45].mxu0 }
0x11a6   :  { %v1659_v28 = vpop.f32.mrb[46].mxu0 }
0x11a7   :  { %v1660_v29 = vadd.f32 %v2142_v31, %v1659_v28  ;;  %v2399_v30 = vpop.f32.mrb[47].mxu0  ;;  %v1663_v33 = vadd.f32 %v1657_v26, %v2935_v57 }
0x11a9   :  { %v1669_v34 = vsel %vm73_vm0, %v1663_v33, 0.0  ;;  %v1664_v4 = vadd.f32 %v1660_v29, %v2937_v58  ;;  %v2461_v58 = vld [vmem:[%s3163_s10 + $0x10] sm:$0xff]  }
0x11aa   :  { %1670 = vadd.xlane.f32.xlu0 %v1669_v34  ;;  %2401 = vmatpush3.bf16.msra.mxu1 %v2461_v58 }
0x11ab   :  { %v1672_v6 = vsel %vm73_vm0, %v1664_v4, 0.0  ;;  %2402 = vmatprep.subr.bf16.mxu1 %v2587_v15 }
0x11ac   :  { %1673 = vadd.xlane.f32.xlu1 %v1672_v6 }
0x11ae   :  { %2403 = vmatpush3.bf16.msra.mxu1 %v2462_v46 }
0x11af   :  { %2420 = vmatprep.subr.bf16.mxu1 %v2587_v15 }
0x1237   :  { %v1671_v35 = vpop.xlane.xlu0 %1670 }
0x1238   :  { %v1675_v5 = vmul.f32 0.03125, %v1671_v35 }
0x1239   :  { %v1674_v36 = vpop.xlane.xlu1 %1673 }
0x123a   :  { %v1677_v37 = vsub.f32 %v1663_v33, %v1675_v5  ;;  %v1676_v38 = vmul.f32 0.03125, %v1674_v36  ;;  %v2168_v33 = vld [vmem:[%s3166_s13 + $0x1] ss:$0 sm:$0xff] }
0x123c   :  { %v1678_v39 = vsub.f32 %v1664_v4, %v1676_v38  ;;  %v1679_v40 = vmul.f32 %v1677_v37, %v1677_v37 }
0x123e   :  { %v1681_v41 = vsel %vm73_vm0, %v1679_v40, 0.0  ;;  %v1680_v45 = vmul.f32 %v1678_v39, %v1678_v39 }
0x123f   :  { %1682 = vadd.xlane.f32.xlu0 %v1681_v41 }
0x1240   :  { %v1684_v57 = vsel %vm73_vm0, %v1680_v45, 0.0 }
0x1243   :  { %1685 = vadd.xlane.f32.xlu0 %v1684_v57 }
0x12cc   :  { %v1683_v47 = vpop.xlane.xlu0 %1682 }
0x12cd   :  { %v1687_v48 = vmul.f32 0.03125, %v1683_v47 }
0x12cf   :  { %v1689_v49 = vadd.f32 1e-12, %v1687_v48 }
0x12d0   :  { %v1686_v53 = vpop.xlane.xlu0 %1685 }
0x12d1   :  { %2551 = vrsqrt.f32 %v1689_v49  ;;  %v1688_v50 = vmul.f32 0.03125, %v1686_v53 }
0x12d3   :  { %v1690_v51 = vadd.f32 1e-12, %v1688_v50 }
0x12d5   :  { %2553 = vrsqrt.f32 %v1690_v51  ;;  %v2467_v51 = vld [vmem:[%s3169_s16] sm:$0xff]  }
0x12db   :  { %v2552_v55 = vpop.eup %2551 }
0x12dc   :  { %v1693_v52 = vmul.f32 %v2552_v55, %v1677_v37  ;;  %v2468_v55 = vld [vmem:[%s3169_s16 + $0x8] sm:$0xff]  }
0x12de   :  { %v1701_v59 = vmul.f32 %v2148_v54, %v1693_v52 }
0x12df   :  { %v2554_v56 = vpop.eup %2553 }
0x12e0   :  { %v1694_v60 = vmul.f32 %v2554_v56, %v1678_v39  ;;  %v1709_v63 = vadd.f32 %v2149_v61, %v1701_v59 }
0x12e2   :  { %v1702_v62 = vmul.f32 %v2148_v54, %v1694_v60 }
0x12e4   :  { %v1710_v0 = vadd.f32 %v2149_v61, %v1702_v62 }
0x12e6   :  { %v1711_v1 = vpack.c.bf16 %v1710_v0, %v1709_v63 }
0x12e8   :  { %2405 = vmatmul.mubr.msk.bf16.vlgmr.msra.gmra.mrb[40].mxu1 %vm73_vm0, %v1711_v1  ;;  %v2176_v1 = vld [vmem:[%s3167_s14 + $0x1] ss:$0 sm:$0xff] }
0x12e9   :  { %2424 = vmatprep.mubr.msk.bf16.mxu1 %vm2588_vm1, %v2587_v15  ;;  %2421 = vmatpush3.bf16.msra.mxu1 %v2467_v51 }
0x12ea   :  { %2422 = vmatprep.subr.bf16.mxu1 %v2587_v15 }
0x12ed   :  { %2423 = vmatpush3.bf16.msra.mxu1 %v2468_v55 }
0x12ee   :  { %2428 = vmatprep.subr.bf16.mxu1 %v2587_v15 }
0x13bb   :  { %v1774_v10 = vpop.f32.mrb[40].mxu1 }
0x13bc   :  { %v1775_v11 = vadd.f32 %v2155_v9, %v1774_v10  ;;  %v2406_v12 = vpop.f32.mrb[41].mxu1 }
0x13bd   :  { %v1777_v13 = vpop.f32.mrb[42].mxu1 }
0x13be   :  { %v1781_v14 = vmul.f32 %v1775_v11, %v1775_v11  ;;  %v1778_v42 = vadd.f32 %v2155_v9, %v1777_v13  ;;  %v2407_v44 = vpop.f32.mrb[43].mxu1 }
0x13bf   :  { %v2178_v44 = vld [vmem:[%s3170_s17] ss:$0 sm:$0xff] }
0x13c0   :  { %v1783_v16 = vmul.f32 %v1781_v14, %v1775_v11  ;;  %v1782_v43 = vmul.f32 %v1778_v42, %v1778_v42  ;;  %v2469_v14 = vld [vmem:[%s3171_s18] sm:$0xff]  }
0x13c2   :  { %v1785_v17 = vmul.f32 0.044715, %v1783_v16  ;;  %v1784_v18 = vmul.f32 %v1782_v43, %v1778_v42 }
0x13c4   :  { %v1787_v19 = vadd.f32 %v1785_v17, %v1775_v11  ;;  %v1786_v20 = vmul.f32 0.044715, %v1784_v18 }
0x13c6   :  { %v1789_v21 = vmul.f32 0.7978846, %v1787_v19  ;;  %v1788_v22 = vadd.f32 %v1786_v20, %v1778_v42 }
0x13c8   :  { %2555 = vtanh.f32 %v1789_v21  ;;  %v1790_v23 = vmul.f32 0.7978846, %v1788_v22 }
0x13ca   :  { %2557 = vtanh.f32 %v1790_v23 }
0x13d2   :  { %v2556_v24 = vpop.eup %2555 }
0x13d3   :  { %v1793_v25 = vadd.f32 1.0, %v2556_v24 }
0x13d4   :  { %v2558_v31 = vpop.eup %2557 }
0x13d5   :  { %v1795_v32 = vmul.f32 0.5, %v1793_v25  ;;  %v1794_v26 = vadd.f32 1.0, %v2558_v31 }
0x13d7   :  { %v1796_v27 = vmul.f32 0.5, %v1794_v26  ;;  %v1797_v28 = vmul.f32 %v1795_v32, %v1775_v11 }
0x13d9   :  { %v1798_v29 = vmul.f32 %v1796_v27, %v1778_v42  ;;  %v2470_v42 = vld [vmem:[%s3171_s18 + $0x8] sm:$0xff]   ;;  %s2080_s18 = sshll.u32 %s2597_s30, 4  ;;  %s2081_s18 = int_to_ptr.vmem [resolvable:$true] %s2080_s18 }
0x13da   :  { %s2563_s17 = scalar_lea.vmem %s2081_s18, 32  ;;  %p2568_p1 = scmp.lt.s32.totalorder %s2081_s18, %s2081_s18 }
0x13db   :  { %v1799_v30 = vpack.c.bf16 %v1798_v29, %v1797_v28  ;;  %p2564_p0 = scmp.ne.s32.totalorder %s2081_s18, %s2563_s17  ;;  %p2569_p2 = scmp.lt.s32.totalorder %s2563_s17, %s2563_s17 }
0x13dd   :  { %2417 = vmatmul.mubr.msk.bf16.vlgmr.msra.gmra.mrb[48].mxu0 %vm930_vm5, %v1799_v30  ;;  %p2570_p3 = por %p2569_p2, %p2568_p1 }
0x13df   :  { %p2571_p4 = pnand %p2570_p3, %p2564_p0 }
0x14b0   :  { %v1878_v34 = vpop.f32.mrb[48].mxu0 }
0x14b1   :  { %v1879_v4 = vadd.f32 %v2168_v33, %v1878_v34  ;;  %v2418_v6 = vpop.f32.mrb[49].mxu0 }
0x14b2   :  { %v1881_v35 = vpop.f32.mrb[50].mxu0 }
0x14b3   :  { %v1882_v5 = vadd.f32 %v2168_v33, %v1881_v35  ;;  %v2419_v36 = vpop.f32.mrb[51].mxu0  ;;  %v1885_v37 = vadd.f32 %v1879_v4, %v1709_v63 }
0x14b5   :  { %v1891_v38 = vsel %vm73_vm0, %v1885_v37, 0.0  ;;  %v1886_v39 = vadd.f32 %v1882_v5, %v1710_v0 }
0x14b6   :  { %1892 = vadd.xlane.f32.xlu1 %v1891_v38 }
0x14b7   :  { %v1894_v40 = vsel %vm73_vm0, %v1886_v39, 0.0 }
0x14b8   :  { %1895 = vadd.xlane.f32.xlu0 %v1894_v40 }
0x1543   :  { %v1893_v41 = vpop.xlane.xlu1 %1892 }
0x1544   :  { %v1897_v45 = vmul.f32 0.03125, %v1893_v41 }
0x1545   :  { %v1896_v57 = vpop.xlane.xlu0 %1895 }
0x1546   :  { %v1899_v58 = vsub.f32 %v1885_v37, %v1897_v45  ;;  %v1898_v46 = vmul.f32 0.03125, %v1896_v57 }
0x1548   :  { %v1900_v47 = vsub.f32 %v1886_v39, %v1898_v46  ;;  %v1901_v48 = vmul.f32 %v1899_v58, %v1899_v58 }
0x154a   :  { %v1903_v49 = vsel %vm73_vm0, %v1901_v48, 0.0  ;;  %v1902_v53 = vmul.f32 %v1900_v47, %v1900_v47 }
0x154b   :  { %1904 = vadd.xlane.f32.xlu1 %v1903_v49 }
0x154c   :  { %v1906_v50 = vsel %vm73_vm0, %v1902_v53, 0.0 }
0x154d   :  { %1907 = vadd.xlane.f32.xlu0 %v1906_v50 }
0x15d8   :  { %v1905_v52 = vpop.xlane.xlu1 %1904 }
0x15d9   :  { %v1909_v54 = vmul.f32 0.03125, %v1905_v52 }
0x15da   :  { %v1908_v56 = vpop.xlane.xlu0 %1907 }
0x15db   :  { %v1911_v59 = vadd.f32 1e-12, %v1909_v54  ;;  %v1910_v60 = vmul.f32 0.03125, %v1908_v56 }
0x15dd   :  { %2559 = vrsqrt.f32 %v1911_v59  ;;  %v1912_v61 = vadd.f32 1e-12, %v1910_v60 }
0x15df   :  { %2561 = vrsqrt.f32 %v1912_v61 }
0x15e7   :  { %v2560_v62 = vpop.eup %2559 }
0x15e8   :  { %v1915_v63 = vmul.f32 %v2560_v62, %v1899_v58 }
0x15e9   :  { %v2562_v0 = vpop.eup %2561 }
0x15ea   :  { %v1916_v2 = vmul.f32 %v2562_v0, %v1900_v47  ;;  %v1923_v3 = vmul.f32 %v2176_v1, %v1915_v63 }
0x15ec   :  { %v1924_v7 = vmul.f32 %v2176_v1, %v1916_v2  ;;  %v1931_v10 = vadd.f32 %v2177_v8, %v1923_v3 }
0x15ee   :  { %v1932_v9 = vadd.f32 %v2177_v8, %v1924_v7 }
0x15f0   :  { %v1934_v11 = vrot.slane %v1932_v9, 7 }
0x15f2   :  { %v1937_v12 = vsel %vm1936_vm6, %v1931_v10, %v1934_v11 }
0x15f3   :  { %v1938_v13 = vpack.c.bf16 %v1937_v12, %v1937_v12 }
0x15f5   :  { %2425 = vmatmul.mubr.msk.bf16.vlgmr.msra.gmra.mrb[44].mxu1 %vm73_vm0, %v1938_v13 }
0x15f6   :  { %2432 = vmatprep.mubr.msk.bf16.mxu1 %vm2588_vm1, %v2587_v15  ;;  %2429 = vmatpush3.bf16.msra.mxu1 %v2469_v14 }
0x15f7   :  { %2430 = vmatprep.subr.bf16.mxu1 %v2587_v15  ;;  %v2182_v15 = vld [vmem:[%s3172_s19] ss:$0 sm:$0xff] }
0x15fa   :  { %2431 = vmatpush3.bf16.msra.mxu1 %v2470_v42 }
0x16c8   :  { %v1999_v16 = vpop.f32.mrb[44].mxu1 }
0x16c9   :  { %v2000_v43 = vadd.f32 %v2178_v44, %v1999_v16  ;;  %v2426_v17 = vpop.f32.mrb[45].mxu1 }
0x16ca   :  { %v2002_v18 = vpop.f32.mrb[46].mxu1 }
0x16cb   :  { %v2005_v19 = vmax.f32 %v2000_v43, 0.0  ;;  %v2427_v20 = vpop.f32.mrb[47].mxu1 }
0x16cd   :  { %v2006_v21 = vpack.c.bf16 %v2005_v19, %v2005_v19 }
0x16cf   :  { %2433 = vmatmul.mubr.msk.bf16.vlgmr.msra.gmra.mrb[48].mxu1 %vm73_vm0, %v2006_v21 }
0x17a2   :  { %v2067_v22 = vpop.f32.mrb[48].mxu1 }
0x17a3   :  { %v2068_v23 = vadd.f32 %v2182_v15, %v2067_v22  ;;  %v2434_v24 = vpop.f32.mrb[49].mxu1 }
0x17a4   :  { %v2070_v25 = vpop.f32.mrb[50].mxu1 }
0x17a5   :  { %2073 = vst [vmem:[#allocation2] sm:$0x3] %v2068_v23  ;;  %v2435_v31 = vpop.f32.mrb[51].mxu1 }
0x17a6   :  { %2574 = shalt.err (!%p2571_p4)
}
0x17a7   :  { %s2575_s19 = scalar_lea.hbm %s3173_s20, 32 }
0x17a8   :  { %p2576_p5 = scmp.ne.s32.totalorder %s3173_s20, %s2575_s19  ;;  %p2579_p6 = scmp.lt.u32.totalorder %s2575_s19, %s3173_s20 }
0x17aa   :  { %p2581_p7 = pnand %p2579_p6, %p2576_p5 }
0x17ac   :  { %2584 = shalt.err (!%p2581_p7)
}
0x17ad   :  { %2083 = dma.vmem_to_hbm [thread:$0]  %s2081_s18, 32, %s3173_s20, [#allocation3]  }
0x17ae   :  { %2585 = dma.done.wait [#allocation3], 32  }
0x17af   :  { %2586 = vsyncadd [#allocation3], 4294967264 }
0x17b0   :  { %2087 = vsyncpa [#allocation3], 1 }

</bundles_post_ra>
